<compile_context>
chip_gen: v7x
topology: tpu7x:2x2x1
jax: 0.10.0
libtpu: 0.0.40
codegen_flags: <defaults>
</compile_context>

<pallas_src>
import functools
import math

import jax
import jax.numpy as jnp
from jax.experimental import pallas as pl
from jax.experimental.pallas import tpu as pltpu


def mha_kernel(q_ref, k_ref, v_ref, mask_ref,
               wq_ref, bq_ref, wk_ref, bk_ref, wv_ref, bv_ref,
               wo_ref, bo_ref, gamma_ref, beta_ref,
               out_ref, attn_ref,
               kT_scr, v_scr, ctx_scr,
               *, n_heads, d_k, d_v):
    t = pl.program_id(1)
    mm_dtype = kT_scr.dtype           # MXU compute dtype (bf16 by default)

    # --- K/V projections: once per batch element (t == 0), kept in VMEM -------
    @pl.when(t == 0)
    def _project_kv():
        k_in = k_ref[0].astype(mm_dtype)                       # (S, d_model)
        v_in = v_ref[0].astype(mm_dtype)
        k_s = jnp.dot(k_in, wk_ref[...],
                      preferred_element_type=jnp.float32) + bk_ref[...]
        v_s = jnp.dot(v_in, wv_ref[...],
                      preferred_element_type=jnp.float32) + bv_ref[...]
        # Pre-transpose K once per batch so every (head, q-tile) scores matmul is
        # a plain (TQ,d_k)@(d_k,S); per-head split of V paid once per batch.
        kT_scr[...] = k_s.T.astype(mm_dtype)                   # (H*d_k, S)
        for h in range(n_heads):
            v_scr[h] = v_s[:, h * d_v:(h + 1) * d_v].astype(mm_dtype)

    # --- Q projection for this query tile; fold 1/sqrt(d_k) into q ------------
    q_in = q_ref[0]                                            # (TQ, d_model)
    q_s = jnp.dot(q_in.astype(mm_dtype), wq_ref[...],
                  preferred_element_type=jnp.float32) + bq_ref[...]
    q_s = (q_s * jnp.float32(1.0 / math.sqrt(d_k))).astype(mm_dtype)

    masked = mask_ref[0] != 0                                  # (TQ, S) bool

    # --- per-head attention ----------------------------------------------------
    # TODO(synk): for large n_heads, switch to lax.fori_loop + pl.ds so the
    # (TQ, S) f32 temporaries' live ranges are bounded per head (v7x VMEM).
    for h in range(n_heads):
        qh = q_s[:, h * d_k:(h + 1) * d_k]                     # (TQ, d_k)
        khT = kT_scr[h * d_k:(h + 1) * d_k, :]                 # (d_k, S) sublane slice
        scores = jnp.dot(qh, khT,
                         preferred_element_type=jnp.float32)   # (TQ, S) f32
        scores = jnp.where(masked, jnp.float32(-1e9), scores)

        # softmax kept fully in f32
        m = jnp.max(scores, axis=-1, keepdims=True)
        e = jnp.exp(scores - m)
        denom = jnp.sum(e, axis=-1, keepdims=True)
        inv = jnp.float32(1.0) / denom      # exact: rows of the returned attn sum to 1
        attn_h = e * inv                                       # (TQ, S) f32

        attn_ref[0, h] = attn_h.astype(attn_ref.dtype)

        ctx_h = jnp.dot(attn_h.astype(mm_dtype), v_scr[h],
                        preferred_element_type=jnp.float32)    # (TQ, d_v) f32
        ctx_scr[:, h * d_v:(h + 1) * d_v] = ctx_h.astype(ctx_scr.dtype)

    # --- output projection + residual + LayerNorm (f32) ------------------------
    output = jnp.dot(ctx_scr[...], wo_ref[...],
                     preferred_element_type=jnp.float32) + bo_ref[...]
    resid = output + q_in.astype(jnp.float32)
    mean = jnp.mean(resid, axis=-1, keepdims=True)
    var = jnp.mean((resid - mean) ** 2, axis=-1, keepdims=True)
    normed = (resid - mean) * jax.lax.rsqrt(var + jnp.float32(1e-5))
    y = normed * gamma_ref[...] + beta_ref[...]
    out_ref[0] = y.astype(out_ref.dtype)


def _vmem_capacity_bytes():
    """Per-TensorCore VMEM capacity (64 MiB on v7x, 128 MiB on v5e/v6e)."""
    try:
        return int(pltpu.get_tpu_info().vmem_capacity_bytes)
    except Exception:
        return 64 * 1024 * 1024  # conservative fallback (v7x)


def multi_head_attention(Q, K, V, attn_mask, params, *, d_model, d_k, d_v,
                         n_heads, matmul_dtype=jnp.bfloat16, attn_dtype=None):
    wq, bq, wk, bk, wv, bv, wo, bo, gamma, beta = params
    B, S, _ = Q.shape
    if attn_dtype is None:
        attn_dtype = Q.dtype   # pass jnp.bfloat16 to halve the attn-weights writeback

    vmem_cap = _vmem_capacity_bytes()
    # v5e/v6e (128 MiB VMEM): TQ=256 amortizes grid overhead; v7x (64 MiB): TQ=128.
    tq_target = 256 if vmem_cap >= 96 * 1024 * 1024 else 128

    if S <= tq_target:
        TQ, S_pad = S, S
    else:
        TQ = tq_target
        S_pad = pl.cdiv(S, TQ) * TQ            # pad ragged S (masked tail keys)
    T = S_pad // TQ

    # 1-byte mask instead of f32 -- cuts mask HBM traffic 4x.
    mask_i8 = (attn_mask != 0).astype(jnp.int8)
    Qp = Q
    Kp = K.astype(matmul_dtype)
    Vp = V.astype(matmul_dtype)
    if S_pad != S:
        pad = S_pad - S
        Qp = jnp.pad(Qp, ((0, 0), (0, pad), (0, 0)))
        Kp = jnp.pad(Kp, ((0, 0), (0, pad), (0, 0)))
        Vp = jnp.pad(Vp, ((0, 0), (0, pad), (0, 0)))
        # padded key columns masked; padded query rows are sliced off below
        mask_i8 = jnp.pad(mask_i8, ((0, 0), (0, pad), (0, pad)),
                          constant_values=jnp.int8(1))

    # Weights in the MXU dtype; biases / LayerNorm params stay f32.
    wq_c, wk_c, wv_c, wo_c = (w.astype(matmul_dtype) for w in (wq, wk, wv, wo))

    kernel = functools.partial(mha_kernel, n_heads=n_heads, d_k=d_k, d_v=d_v)

    def const_spec(arr):
        shape = arr.shape
        # constant block index => fetched once; Buffered(1) => no double buffer
        return pl.BlockSpec(shape, lambda b, t: (0,) * len(shape),
                            pipeline_mode=pl.Buffered(1))

    grid_spec = pltpu.PrefetchScalarGridSpec(
        num_scalar_prefetch=0,
        grid=(B, T),
        in_specs=[
            pl.BlockSpec((1, TQ, d_model), lambda b, t: (b, t, 0)),      # Q tile
            pl.BlockSpec((1, S_pad, d_model), lambda b, t: (b, 0, 0),    # K (per batch)
                         pipeline_mode=pl.Buffered(1)),
            pl.BlockSpec((1, S_pad, d_model), lambda b, t: (b, 0, 0),    # V (per batch)
                         pipeline_mode=pl.Buffered(1)),
            pl.BlockSpec((1, TQ, S_pad), lambda b, t: (b, t, 0)),        # mask tile
            const_spec(wq_c), const_spec(bq),
            const_spec(wk_c), const_spec(bk),
            const_spec(wv_c), const_spec(bv),
            const_spec(wo_c), const_spec(bo),
            const_spec(gamma), const_spec(beta),
        ],
        out_specs=[
            pl.BlockSpec((1, TQ, d_model), lambda b, t: (b, t, 0)),
            pl.BlockSpec((1, n_heads, TQ, S_pad), lambda b, t: (b, 0, t, 0)),
        ],
        scratch_shapes=[
            pltpu.VMEM((n_heads * d_k, S_pad), matmul_dtype),   # projected K, transposed
            pltpu.VMEM((n_heads, S_pad, d_v), matmul_dtype),    # projected V, per head
            pltpu.VMEM((TQ, n_heads * d_v), matmul_dtype),      # per-tile context
        ],
    )

    out_shapes = (
        jax.ShapeDtypeStruct((B, S_pad, d_model), Q.dtype),
        jax.ShapeDtypeStruct((B, n_heads, S_pad, S_pad), attn_dtype),
    )

    # Generation-aware scoped-VMEM limit (leave headroom for compiler internals).
    vmem_limit = int(max(32 * 1024 * 1024,
                         min(vmem_cap, 128 * 1024 * 1024) - 16 * 1024 * 1024))

    # TODO(synk): for B < num_tensorcores (v7x small-batch inference), add a leading
    # core-split grid axis over q-tiles/heads so both TensorCores stay busy.
    out, attn = pl.pallas_call(
        kernel,
        out_shape=out_shapes,
        grid_spec=grid_spec,
        compiler_params=pltpu.CompilerParams(
            dimension_semantics=("parallel", "arbitrary"),
            vmem_limit_bytes=vmem_limit,
        ),
    )(Qp, Kp, Vp, mask_i8, wq_c, bq, wk_c, bk, wv_c, bv, wo_c, bo, gamma, beta)

    if S_pad != S:
        out = out[:, :S, :]
        attn = attn[:, :, :S, :S]
    return out, attn


def init_params(key, d_model, d_k, d_v, n_heads):
    ks = jax.random.split(key, 8)

    def linear(kw, kb, fan_in, fan_out):
        bound = 1.0 / math.sqrt(fan_in)
        # stored as [in, out] (transposed relative to torch's [out, in])
        w = jax.random.uniform(kw, (fan_in, fan_out), jnp.float32, -bound, bound)
        b = jax.random.uniform(kb, (1, fan_out), jnp.float32, -bound, bound)
        return w, b

    wq, bq = linear(ks[0], ks[1], d_model, d_k * n_heads)
    wk, bk = linear(ks[2], ks[3], d_model, d_k * n_heads)
    wv, bv = linear(ks[4], ks[5], d_model, d_v * n_heads)
    wo, bo = linear(ks[6], ks[7], n_heads * d_v, d_model)
    gamma = jnp.ones((1, d_model), jnp.float32)
    beta = jnp.zeros((1, d_model), jnp.float32)
    return (wq, bq, wk, bk, wv, bv, wo, bo, gamma, beta)


def reference_mha(Q, K, V, attn_mask, params, *, d_model, d_k, d_v, n_heads):
    """Pure-JAX (f32) mirror of the PyTorch module for a correctness check."""
    wq, bq, wk, bk, wv, bv, wo, bo, gamma, beta = params
    B, S, _ = Q.shape
    q_s = (Q @ wq + bq).reshape(B, S, n_heads, d_k).transpose(0, 2, 1, 3)
    k_s = (K @ wk + bk).reshape(B, S, n_heads, d_k).transpose(0, 2, 1, 3)
    v_s = (V @ wv + bv).reshape(B, S, n_heads, d_v).transpose(0, 2, 1, 3)
    scores = jnp.einsum('bhqd,bhkd->bhqk', q_s, k_s) / math.sqrt(d_k)
    mask = (attn_mask != 0)[:, None, :, :]
    scores = jnp.where(mask, jnp.float32(-1e9), scores)
    attn = jax.nn.softmax(scores, axis=-1)
    context = jnp.einsum('bhqk,bhkd->bhqd', attn, v_s)
    context = context.transpose(0, 2, 1, 3).reshape(B, S, n_heads * d_v)
    output = context @ wo + bo
    resid = output + Q
    mean = resid.mean(-1, keepdims=True)
    var = ((resid - mean) ** 2).mean(-1, keepdims=True)
    y = (resid - mean) / jnp.sqrt(var + 1e-5) * gamma + beta
    return y, attn


if __name__ == "__main__":
    B, S, d_model, n_heads, d_k, d_v = 2, 8, 32, 4, 8, 8

    key = jax.random.PRNGKey(0)
    kq, kk, kv, kp = jax.random.split(key, 4)
    Q = jax.random.normal(kq, (B, S, d_model), jnp.float32)
    K = jax.random.normal(kk, (B, S, d_model), jnp.float32)
    V = jax.random.normal(kv, (B, S, d_model), jnp.float32)

    # causal-ish mask: mask future positions (nonzero => masked)
    tri = jnp.triu(jnp.ones((S, S), jnp.float32), k=1)
    attn_mask = jnp.broadcast_to(tri, (B, S, S))

    params = init_params(kp, d_model, d_k, d_v, n_heads)

    out, attn = multi_head_attention(Q, K, V, attn_mask, params,
                                     d_model=d_model, d_k=d_k,
                                     d_v=d_v, n_heads=n_heads)
    jax.block_until_ready((out, attn))

    assert out.shape == (B, S, d_model)
    assert attn.shape == (B, n_heads, S, S)

    ref_out, ref_attn = reference_mha(Q, K, V, attn_mask, params,
                                      d_model=d_model, d_k=d_k,
                                      d_v=d_v, n_heads=n_heads)

    # Kernel runs MXU operands in bf16 (f32 accumulation / softmax / LayerNorm),
    # reference is pure f32 -> compare with bf16-appropriate max-abs bounds.
    err_out = float(jnp.max(jnp.abs(out - ref_out)))
    err_attn = float(jnp.max(jnp.abs(attn - ref_attn)))
    row_err = float(jnp.max(jnp.abs(jnp.sum(attn, axis=-1) - 1.0)))
    assert err_out < 5e-2, f"output mismatch, max abs err={err_out}"
    assert err_attn < 3e-2, f"attention mismatch, max abs err={err_attn}"
    assert row_err < 1e-3, f"attention rows do not sum to 1, err={row_err}"
    print("KERNEL_OK")
</pallas_src>

<mosaic_0001>
module attributes {stable_mosaic.version = 11 : i64} {
  func.func @mha_kernel(%arg0: i32, %arg1: i32, %arg2: memref<1x8x32xf32, #tpu.memory_space<vmem>>, %arg3: memref<1x8x32xbf16, #tpu.memory_space<vmem>>, %arg4: memref<1x8x32xbf16, #tpu.memory_space<vmem>>, %arg5: memref<1x8x8xi8, #tpu.memory_space<vmem>>, %arg6: memref<32x32xbf16, #tpu.memory_space<vmem>>, %arg7: memref<1x32xf32, #tpu.memory_space<vmem>>, %arg8: memref<32x32xbf16, #tpu.memory_space<vmem>>, %arg9: memref<1x32xf32, #tpu.memory_space<vmem>>, %arg10: memref<32x32xbf16, #tpu.memory_space<vmem>>, %arg11: memref<1x32xf32, #tpu.memory_space<vmem>>, %arg12: memref<32x32xbf16, #tpu.memory_space<vmem>>, %arg13: memref<1x32xf32, #tpu.memory_space<vmem>>, %arg14: memref<1x32xf32, #tpu.memory_space<vmem>>, %arg15: memref<1x32xf32, #tpu.memory_space<vmem>>, %arg16: memref<1x8x32xf32, #tpu.memory_space<vmem>>, %arg17: memref<1x4x8x8xf32, #tpu.memory_space<vmem>>, %arg18: memref<32x8xbf16, #tpu.memory_space<vmem>>, %arg19: memref<4x8x8xbf16, #tpu.memory_space<vmem>>, %arg20: memref<8x32xbf16, #tpu.memory_space<vmem>>) attributes {dimension_semantics = [#tpu.dimension_semantics<parallel>, #tpu.dimension_semantics<arbitrary>], iteration_bounds = array<i64: 2, 1>, scalar_prefetch = 0 : i64, scratch_operands = 3 : i64, tpu.core_type = #tpu.core_type<tc>, window_params = [{transform_indices = @transform_0, window_bounds = array<i64: 1, 8, 32>}, {pipeline_mode = #tpu.pipeline_mode<synchronous>, transform_indices = @transform_1, window_bounds = array<i64: 1, 8, 32>}, {pipeline_mode = #tpu.pipeline_mode<synchronous>, transform_indices = @transform_2, window_bounds = array<i64: 1, 8, 32>}, {transform_indices = @transform_3, window_bounds = array<i64: 1, 8, 8>}, {pipeline_mode = #tpu.pipeline_mode<synchronous>, transform_indices = @transform_4, window_bounds = array<i64: 32, 32>}, {pipeline_mode = #tpu.pipeline_mode<synchronous>, transform_indices = @transform_5, window_bounds = array<i64: 1, 32>}, {pipeline_mode = #tpu.pipeline_mode<synchronous>, transform_indices = @transform_6, window_bounds = array<i64: 32, 32>}, {pipeline_mode = #tpu.pipeline_mode<synchronous>, transform_indices = @transform_7, window_bounds = array<i64: 1, 32>}, {pipeline_mode = #tpu.pipeline_mode<synchronous>, transform_indices = @transform_8, window_bounds = array<i64: 32, 32>}, {pipeline_mode = #tpu.pipeline_mode<synchronous>, transform_indices = @transform_9, window_bounds = array<i64: 1, 32>}, {pipeline_mode = #tpu.pipeline_mode<synchronous>, transform_indices = @transform_10, window_bounds = array<i64: 32, 32>}, {pipeline_mode = #tpu.pipeline_mode<synchronous>, transform_indices = @transform_11, window_bounds = array<i64: 1, 32>}, {pipeline_mode = #tpu.pipeline_mode<synchronous>, transform_indices = @transform_12, window_bounds = array<i64: 1, 32>}, {pipeline_mode = #tpu.pipeline_mode<synchronous>, transform_indices = @transform_13, window_bounds = array<i64: 1, 32>}, {transform_indices = @transform_14, window_bounds = array<i64: 1, 8, 32>}, {transform_indices = @transform_15, window_bounds = array<i64: 1, 4, 8, 8>}]} {
    %c0_i32 = arith.constant 0 : i32
    %0 = arith.cmpi eq, %arg1, %c0_i32 : i32
    %1 = arith.extui %0 : i1 to i32
    %c0_i32_0 = arith.constant 0 : i32
    %2 = arith.cmpi ne, %1, %c0_i32_0 : i32
    scf.if %2 {
      %c0_92 = arith.constant 0 : index
      %c0_93 = arith.constant 0 : index
      %c0_94 = arith.constant 0 : index
      %152 = vector.load %arg3[%c0_92, %c0_93, %c0_94] : memref<1x8x32xbf16, #tpu.memory_space<vmem>>, vector<1x8x32xbf16>
      %153 = vector.shape_cast %152 : vector<1x8x32xbf16> to vector<8x32xbf16>
      %c0_95 = arith.constant 0 : index
      %c0_96 = arith.constant 0 : index
      %c0_97 = arith.constant 0 : index
      %154 = vector.load %arg4[%c0_95, %c0_96, %c0_97] : memref<1x8x32xbf16, #tpu.memory_space<vmem>>, vector<1x8x32xbf16>
      %155 = vector.shape_cast %154 : vector<1x8x32xbf16> to vector<8x32xbf16>
      %c0_98 = arith.constant 0 : index
      %c0_99 = arith.constant 0 : index
      %156 = vector.load %arg8[%c0_98, %c0_99] : memref<32x32xbf16, #tpu.memory_space<vmem>>, vector<32x32xbf16>
      %cst_100 = arith.constant dense<0.000000e+00> : vector<8x32xf32>
      %157 = tpu.matmul %153, %156, %cst_100 {dimension_numbers = #tpu.dot_dimension_numbers<[1], [0], [0], [1], [0, 0, 1, 1], [], []>} : vector<8x32xbf16>, vector<32x32xbf16>, vector<8x32xf32> -> vector<8x32xf32>
      %c0_101 = arith.constant 0 : index
      %c0_102 = arith.constant 0 : index
      %158 = vector.load %arg9[%c0_101, %c0_102] : memref<1x32xf32, #tpu.memory_space<vmem>>, vector<1x32xf32>
      %159 = vector.broadcast %158 : vector<1x32xf32> to vector<8x32xf32>
      %160 = arith.addf %157, %159 : vector<8x32xf32>
      %c0_103 = arith.constant 0 : index
      %c0_104 = arith.constant 0 : index
      %161 = vector.load %arg10[%c0_103, %c0_104] : memref<32x32xbf16, #tpu.memory_space<vmem>>, vector<32x32xbf16>
      %cst_105 = arith.constant dense<0.000000e+00> : vector<8x32xf32>
      %162 = tpu.matmul %155, %161, %cst_105 {dimension_numbers = #tpu.dot_dimension_numbers<[1], [0], [0], [1], [0, 0, 1, 1], [], []>} : vector<8x32xbf16>, vector<32x32xbf16>, vector<8x32xf32> -> vector<8x32xf32>
      %c0_106 = arith.constant 0 : index
      %c0_107 = arith.constant 0 : index
      %163 = vector.load %arg11[%c0_106, %c0_107] : memref<1x32xf32, #tpu.memory_space<vmem>>, vector<1x32xf32>
      %164 = vector.broadcast %163 : vector<1x32xf32> to vector<8x32xf32>
      %165 = arith.addf %162, %164 : vector<8x32xf32>
      %166 = tpu.transpose %160, [1, 0] : vector<8x32xf32> -> vector<32x8xf32>
      %167 = arith.truncf %166 : vector<32x8xf32> to vector<32x8xbf16>
      %c0_108 = arith.constant 0 : index
      %c0_109 = arith.constant 0 : index
      %168 = vector.load %arg18[%c0_108, %c0_109] : memref<32x8xbf16, #tpu.memory_space<vmem>>, vector<32x8xbf16>
      tpu.vector_store %arg18[%c0_108, %c0_109], %167 {strides = array<i32>} : memref<32x8xbf16, #tpu.memory_space<vmem>>, vector<32x8xbf16>,
      %169 = vector.extract_strided_slice %165 {offsets = [0, 0], sizes = [8, 8], strides = [1, 1]} : vector<8x32xf32> to vector<8x8xf32>
      %170 = arith.truncf %169 : vector<8x8xf32> to vector<8x8xbf16>
      %c0_110 = arith.constant 0 : index
      %c0_111 = arith.constant 0 : index
      %c0_112 = arith.constant 0 : index
      %171 = vector.load %arg19[%c0_110, %c0_111, %c0_112] : memref<4x8x8xbf16, #tpu.memory_space<vmem>>, vector<1x8x8xbf16>
      %172 = vector.shape_cast %171 : vector<1x8x8xbf16> to vector<8x8xbf16>
      %173 = vector.shape_cast %170 : vector<8x8xbf16> to vector<1x8x8xbf16>
      tpu.vector_store %arg19[%c0_110, %c0_111, %c0_112], %173 {strides = array<i32>} : memref<4x8x8xbf16, #tpu.memory_space<vmem>>, vector<1x8x8xbf16>,
      %174 = vector.extract_strided_slice %165 {offsets = [0, 8], sizes = [8, 8], strides = [1, 1]} : vector<8x32xf32> to vector<8x8xf32>
      %175 = arith.truncf %174 : vector<8x8xf32> to vector<8x8xbf16>
      %c1_113 = arith.constant 1 : index
      %c0_114 = arith.constant 0 : index
      %c0_115 = arith.constant 0 : index
      %176 = vector.load %arg19[%c1_113, %c0_114, %c0_115] : memref<4x8x8xbf16, #tpu.memory_space<vmem>>, vector<1x8x8xbf16>
      %177 = vector.shape_cast %176 : vector<1x8x8xbf16> to vector<8x8xbf16>
      %178 = vector.shape_cast %175 : vector<8x8xbf16> to vector<1x8x8xbf16>
      tpu.vector_store %arg19[%c1_113, %c0_114, %c0_115], %178 {strides = array<i32>} : memref<4x8x8xbf16, #tpu.memory_space<vmem>>, vector<1x8x8xbf16>,
      %179 = vector.extract_strided_slice %165 {offsets = [0, 16], sizes = [8, 8], strides = [1, 1]} : vector<8x32xf32> to vector<8x8xf32>
      %180 = arith.truncf %179 : vector<8x8xf32> to vector<8x8xbf16>
      %c2_116 = arith.constant 2 : index
      %c0_117 = arith.constant 0 : index
      %c0_118 = arith.constant 0 : index
      %181 = vector.load %arg19[%c2_116, %c0_117, %c0_118] : memref<4x8x8xbf16, #tpu.memory_space<vmem>>, vector<1x8x8xbf16>
      %182 = vector.shape_cast %181 : vector<1x8x8xbf16> to vector<8x8xbf16>
      %183 = vector.shape_cast %180 : vector<8x8xbf16> to vector<1x8x8xbf16>
      tpu.vector_store %arg19[%c2_116, %c0_117, %c0_118], %183 {strides = array<i32>} : memref<4x8x8xbf16, #tpu.memory_space<vmem>>, vector<1x8x8xbf16>,
      %184 = vector.extract_strided_slice %165 {offsets = [0, 24], sizes = [8, 8], strides = [1, 1]} : vector<8x32xf32> to vector<8x8xf32>
      %185 = arith.truncf %184 : vector<8x8xf32> to vector<8x8xbf16>
      %c3_119 = arith.constant 3 : index
      %c0_120 = arith.constant 0 : index
      %c0_121 = arith.constant 0 : index
      %186 = vector.load %arg19[%c3_119, %c0_120, %c0_121] : memref<4x8x8xbf16, #tpu.memory_space<vmem>>, vector<1x8x8xbf16>
      %187 = vector.shape_cast %186 : vector<1x8x8xbf16> to vector<8x8xbf16>
      %188 = vector.shape_cast %185 : vector<8x8xbf16> to vector<1x8x8xbf16>
      tpu.vector_store %arg19[%c3_119, %c0_120, %c0_121], %188 {strides = array<i32>} : memref<4x8x8xbf16, #tpu.memory_space<vmem>>, vector<1x8x8xbf16>,
    } else {
    }
    %c0 = arith.constant 0 : index
    %c0_1 = arith.constant 0 : index
    %c0_2 = arith.constant 0 : index
    %3 = vector.load %arg2[%c0, %c0_1, %c0_2] : memref<1x8x32xf32, #tpu.memory_space<vmem>>, vector<1x8x32xf32>
    %4 = vector.shape_cast %3 : vector<1x8x32xf32> to vector<8x32xf32>
    %5 = arith.truncf %4 : vector<8x32xf32> to vector<8x32xbf16>
    %c0_3 = arith.constant 0 : index
    %c0_4 = arith.constant 0 : index
    %6 = vector.load %arg6[%c0_3, %c0_4] : memref<32x32xbf16, #tpu.memory_space<vmem>>, vector<32x32xbf16>
    %cst = arith.constant dense<0.000000e+00> : vector<8x32xf32>
    %7 = tpu.matmul %5, %6, %cst {dimension_numbers = #tpu.dot_dimension_numbers<[1], [0], [0], [1], [0, 0, 1, 1], [], []>} : vector<8x32xbf16>, vector<32x32xbf16>, vector<8x32xf32> -> vector<8x32xf32>
    %c0_5 = arith.constant 0 : index
    %c0_6 = arith.constant 0 : index
    %8 = vector.load %arg7[%c0_5, %c0_6] : memref<1x32xf32, #tpu.memory_space<vmem>>, vector<1x32xf32>
    %9 = vector.broadcast %8 : vector<1x32xf32> to vector<8x32xf32>
    %10 = arith.addf %7, %9 : vector<8x32xf32>
    %cst_7 = arith.constant 0.353553385 : f32
    %11 = vector.broadcast %cst_7 : f32 to vector<8x32xf32>
    %12 = arith.mulf %10, %11 : vector<8x32xf32>
    %13 = arith.truncf %12 : vector<8x32xf32> to vector<8x32xbf16>
    %c0_8 = arith.constant 0 : index
    %c0_9 = arith.constant 0 : index
    %c0_10 = arith.constant 0 : index
    %14 = vector.load %arg5[%c0_8, %c0_9, %c0_10] : memref<1x8x8xi8, #tpu.memory_space<vmem>>, vector<1x8x8xi8>
    %15 = vector.shape_cast %14 : vector<1x8x8xi8> to vector<8x8xi8>
    %c0_i8 = arith.constant 0 : i8
    %16 = vector.broadcast %c0_i8 : i8 to vector<8x8xi8>
    %17 = arith.cmpi ne, %15, %16 : vector<8x8xi8>
    %18 = vector.extract_strided_slice %13 {offsets = [0, 0], sizes = [8, 8], strides = [1, 1]} : vector<8x32xbf16> to vector<8x8xbf16>
    %c0_11 = arith.constant 0 : index
    %c0_12 = arith.constant 0 : index
    %19 = vector.load %arg18[%c0_11, %c0_12] : memref<32x8xbf16, #tpu.memory_space<vmem>>, vector<8x8xbf16>
    %cst_13 = arith.constant dense<0.000000e+00> : vector<8x8xf32>
    %20 = tpu.matmul %18, %19, %cst_13 {dimension_numbers = #tpu.dot_dimension_numbers<[1], [0], [0], [1], [0, 0, 1, 1], [], []>} : vector<8x8xbf16>, vector<8x8xbf16>, vector<8x8xf32> -> vector<8x8xf32>
    %cst_14 = arith.constant -1.000000e+09 : f32
    %21 = vector.broadcast %cst_14 : f32 to vector<8x8xf32>
    %22 = arith.select %17, %21, %20 : vector<8x8xi1>, vector<8x8xf32>
    %cst_15 = arith.constant dense<0xFF800000> : vector<8xf32>
    %23 = vector.multi_reduction <maximumf>, %22, %cst_15 [1] : vector<8x8xf32> to vector<8xf32>
    %24 = vector.shape_cast %23 : vector<8xf32> to vector<8x1xf32>
    %25 = vector.broadcast %24 : vector<8x1xf32> to vector<8x8xf32>
    %26 = arith.subf %22, %25 : vector<8x8xf32>
    %27 = math.exp %26 : vector<8x8xf32>
    %cst_16 = arith.constant dense<0.000000e+00> : vector<8xf32>
    %28 = vector.multi_reduction <add>, %27, %cst_16 [1] : vector<8x8xf32> to vector<8xf32>
    %29 = vector.shape_cast %28 : vector<8xf32> to vector<8x1xf32>
    %cst_17 = arith.constant 1.000000e+00 : f32
    %30 = vector.broadcast %cst_17 : f32 to vector<8x1xf32>
    %31 = arith.divf %30, %29 : vector<8x1xf32>
    %32 = vector.broadcast %31 : vector<8x1xf32> to vector<8x8xf32>
    %33 = arith.mulf %27, %32 : vector<8x8xf32>
    %c0_18 = arith.constant 0 : index
    %c0_19 = arith.constant 0 : index
    %c0_20 = arith.constant 0 : index
    %c0_21 = arith.constant 0 : index
    %34 = vector.load %arg17[%c0_18, %c0_19, %c0_20, %c0_21] : memref<1x4x8x8xf32, #tpu.memory_space<vmem>>, vector<1x1x8x8xf32>
    %35 = vector.shape_cast %34 : vector<1x1x8x8xf32> to vector<8x8xf32>
    %36 = vector.shape_cast %33 : vector<8x8xf32> to vector<1x1x8x8xf32>
    tpu.vector_store %arg17[%c0_18, %c0_19, %c0_20, %c0_21], %36 {strides = array<i32>} : memref<1x4x8x8xf32, #tpu.memory_space<vmem>>, vector<1x1x8x8xf32>,
    %37 = arith.truncf %33 : vector<8x8xf32> to vector<8x8xbf16>
    %c0_22 = arith.constant 0 : index
    %c0_23 = arith.constant 0 : index
    %c0_24 = arith.constant 0 : index
    %38 = vector.load %arg19[%c0_22, %c0_23, %c0_24] : memref<4x8x8xbf16, #tpu.memory_space<vmem>>, vector<1x8x8xbf16>
    %39 = vector.shape_cast %38 : vector<1x8x8xbf16> to vector<8x8xbf16>
    %cst_25 = arith.constant dense<0.000000e+00> : vector<8x8xf32>
    %40 = tpu.matmul %37, %39, %cst_25 {dimension_numbers = #tpu.dot_dimension_numbers<[1], [0], [0], [1], [0, 0, 1, 1], [], []>} : vector<8x8xbf16>, vector<8x8xbf16>, vector<8x8xf32> -> vector<8x8xf32>
    %41 = arith.truncf %40 : vector<8x8xf32> to vector<8x8xbf16>
    %c0_26 = arith.constant 0 : index
    %c0_27 = arith.constant 0 : index
    %42 = vector.load %arg20[%c0_26, %c0_27] : memref<8x32xbf16, #tpu.memory_space<vmem>>, vector<8x8xbf16>
    tpu.vector_store %arg20[%c0_26, %c0_27], %41 {strides = array<i32>} : memref<8x32xbf16, #tpu.memory_space<vmem>>, vector<8x8xbf16>,
    %43 = vector.extract_strided_slice %13 {offsets = [0, 8], sizes = [8, 8], strides = [1, 1]} : vector<8x32xbf16> to vector<8x8xbf16>
    %c8 = arith.constant 8 : index
    %c0_28 = arith.constant 0 : index
    %44 = vector.load %arg18[%c8, %c0_28] : memref<32x8xbf16, #tpu.memory_space<vmem>>, vector<8x8xbf16>
    %cst_29 = arith.constant dense<0.000000e+00> : vector<8x8xf32>
    %45 = tpu.matmul %43, %44, %cst_29 {dimension_numbers = #tpu.dot_dimension_numbers<[1], [0], [0], [1], [0, 0, 1, 1], [], []>} : vector<8x8xbf16>, vector<8x8xbf16>, vector<8x8xf32> -> vector<8x8xf32>
    %cst_30 = arith.constant -1.000000e+09 : f32
    %46 = vector.broadcast %cst_30 : f32 to vector<8x8xf32>
    %47 = arith.select %17, %46, %45 : vector<8x8xi1>, vector<8x8xf32>
    %cst_31 = arith.constant dense<0xFF800000> : vector<8xf32>
    %48 = vector.multi_reduction <maximumf>, %47, %cst_31 [1] : vector<8x8xf32> to vector<8xf32>
    %49 = vector.shape_cast %48 : vector<8xf32> to vector<8x1xf32>
    %50 = vector.broadcast %49 : vector<8x1xf32> to vector<8x8xf32>
    %51 = arith.subf %47, %50 : vector<8x8xf32>
    %52 = math.exp %51 : vector<8x8xf32>
    %cst_32 = arith.constant dense<0.000000e+00> : vector<8xf32>
    %53 = vector.multi_reduction <add>, %52, %cst_32 [1] : vector<8x8xf32> to vector<8xf32>
    %54 = vector.shape_cast %53 : vector<8xf32> to vector<8x1xf32>
    %cst_33 = arith.constant 1.000000e+00 : f32
    %55 = vector.broadcast %cst_33 : f32 to vector<8x1xf32>
    %56 = arith.divf %55, %54 : vector<8x1xf32>
    %57 = vector.broadcast %56 : vector<8x1xf32> to vector<8x8xf32>
    %58 = arith.mulf %52, %57 : vector<8x8xf32>
    %c0_34 = arith.constant 0 : index
    %c1 = arith.constant 1 : index
    %c0_35 = arith.constant 0 : index
    %c0_36 = arith.constant 0 : index
    %59 = vector.load %arg17[%c0_34, %c1, %c0_35, %c0_36] : memref<1x4x8x8xf32, #tpu.memory_space<vmem>>, vector<1x1x8x8xf32>
    %60 = vector.shape_cast %59 : vector<1x1x8x8xf32> to vector<8x8xf32>
    %61 = vector.shape_cast %58 : vector<8x8xf32> to vector<1x1x8x8xf32>
    tpu.vector_store %arg17[%c0_34, %c1, %c0_35, %c0_36], %61 {strides = array<i32>} : memref<1x4x8x8xf32, #tpu.memory_space<vmem>>, vector<1x1x8x8xf32>,
    %62 = arith.truncf %58 : vector<8x8xf32> to vector<8x8xbf16>
    %c1_37 = arith.constant 1 : index
    %c0_38 = arith.constant 0 : index
    %c0_39 = arith.constant 0 : index
    %63 = vector.load %arg19[%c1_37, %c0_38, %c0_39] : memref<4x8x8xbf16, #tpu.memory_space<vmem>>, vector<1x8x8xbf16>
    %64 = vector.shape_cast %63 : vector<1x8x8xbf16> to vector<8x8xbf16>
    %cst_40 = arith.constant dense<0.000000e+00> : vector<8x8xf32>
    %65 = tpu.matmul %62, %64, %cst_40 {dimension_numbers = #tpu.dot_dimension_numbers<[1], [0], [0], [1], [0, 0, 1, 1], [], []>} : vector<8x8xbf16>, vector<8x8xbf16>, vector<8x8xf32> -> vector<8x8xf32>
    %66 = arith.truncf %65 : vector<8x8xf32> to vector<8x8xbf16>
    %c0_41 = arith.constant 0 : index
    %c8_42 = arith.constant 8 : index
    %67 = vector.load %arg20[%c0_41, %c8_42] : memref<8x32xbf16, #tpu.memory_space<vmem>>, vector<8x8xbf16>
    tpu.vector_store %arg20[%c0_41, %c8_42], %66 {strides = array<i32>} : memref<8x32xbf16, #tpu.memory_space<vmem>>, vector<8x8xbf16>,
    %68 = vector.extract_strided_slice %13 {offsets = [0, 16], sizes = [8, 8], strides = [1, 1]} : vector<8x32xbf16> to vector<8x8xbf16>
    %c16 = arith.constant 16 : index
    %c0_43 = arith.constant 0 : index
    %69 = vector.load %arg18[%c16, %c0_43] : memref<32x8xbf16, #tpu.memory_space<vmem>>, vector<8x8xbf16>
    %cst_44 = arith.constant dense<0.000000e+00> : vector<8x8xf32>
    %70 = tpu.matmul %68, %69, %cst_44 {dimension_numbers = #tpu.dot_dimension_numbers<[1], [0], [0], [1], [0, 0, 1, 1], [], []>} : vector<8x8xbf16>, vector<8x8xbf16>, vector<8x8xf32> -> vector<8x8xf32>
    %cst_45 = arith.constant -1.000000e+09 : f32
    %71 = vector.broadcast %cst_45 : f32 to vector<8x8xf32>
    %72 = arith.select %17, %71, %70 : vector<8x8xi1>, vector<8x8xf32>
    %cst_46 = arith.constant dense<0xFF800000> : vector<8xf32>
    %73 = vector.multi_reduction <maximumf>, %72, %cst_46 [1] : vector<8x8xf32> to vector<8xf32>
    %74 = vector.shape_cast %73 : vector<8xf32> to vector<8x1xf32>
    %75 = vector.broadcast %74 : vector<8x1xf32> to vector<8x8xf32>
    %76 = arith.subf %72, %75 : vector<8x8xf32>
    %77 = math.exp %76 : vector<8x8xf32>
    %cst_47 = arith.constant dense<0.000000e+00> : vector<8xf32>
    %78 = vector.multi_reduction <add>, %77, %cst_47 [1] : vector<8x8xf32> to vector<8xf32>
    %79 = vector.shape_cast %78 : vector<8xf32> to vector<8x1xf32>
    %cst_48 = arith.constant 1.000000e+00 : f32
    %80 = vector.broadcast %cst_48 : f32 to vector<8x1xf32>
    %81 = arith.divf %80, %79 : vector<8x1xf32>
    %82 = vector.broadcast %81 : vector<8x1xf32> to vector<8x8xf32>
    %83 = arith.mulf %77, %82 : vector<8x8xf32>
    %c0_49 = arith.constant 0 : index
    %c2 = arith.constant 2 : index
    %c0_50 = arith.constant 0 : index
    %c0_51 = arith.constant 0 : index
    %84 = vector.load %arg17[%c0_49, %c2, %c0_50, %c0_51] : memref<1x4x8x8xf32, #tpu.memory_space<vmem>>, vector<1x1x8x8xf32>
    %85 = vector.shape_cast %84 : vector<1x1x8x8xf32> to vector<8x8xf32>
    %86 = vector.shape_cast %83 : vector<8x8xf32> to vector<1x1x8x8xf32>
    tpu.vector_store %arg17[%c0_49, %c2, %c0_50, %c0_51], %86 {strides = array<i32>} : memref<1x4x8x8xf32, #tpu.memory_space<vmem>>, vector<1x1x8x8xf32>,
    %87 = arith.truncf %83 : vector<8x8xf32> to vector<8x8xbf16>
    %c2_52 = arith.constant 2 : index
    %c0_53 = arith.constant 0 : index
    %c0_54 = arith.constant 0 : index
    %88 = vector.load %arg19[%c2_52, %c0_53, %c0_54] : memref<4x8x8xbf16, #tpu.memory_space<vmem>>, vector<1x8x8xbf16>
    %89 = vector.shape_cast %88 : vector<1x8x8xbf16> to vector<8x8xbf16>
    %cst_55 = arith.constant dense<0.000000e+00> : vector<8x8xf32>
    %90 = tpu.matmul %87, %89, %cst_55 {dimension_numbers = #tpu.dot_dimension_numbers<[1], [0], [0], [1], [0, 0, 1, 1], [], []>} : vector<8x8xbf16>, vector<8x8xbf16>, vector<8x8xf32> -> vector<8x8xf32>
    %91 = arith.truncf %90 : vector<8x8xf32> to vector<8x8xbf16>
    %c0_56 = arith.constant 0 : index
    %c16_57 = arith.constant 16 : index
    %92 = vector.load %arg20[%c0_56, %c16_57] : memref<8x32xbf16, #tpu.memory_space<vmem>>, vector<8x8xbf16>
    tpu.vector_store %arg20[%c0_56, %c16_57], %91 {strides = array<i32>} : memref<8x32xbf16, #tpu.memory_space<vmem>>, vector<8x8xbf16>,
    %93 = vector.extract_strided_slice %13 {offsets = [0, 24], sizes = [8, 8], strides = [1, 1]} : vector<8x32xbf16> to vector<8x8xbf16>
    %c24 = arith.constant 24 : index
    %c0_58 = arith.constant 0 : index
    %94 = vector.load %arg18[%c24, %c0_58] : memref<32x8xbf16, #tpu.memory_space<vmem>>, vector<8x8xbf16>
    %cst_59 = arith.constant dense<0.000000e+00> : vector<8x8xf32>
    %95 = tpu.matmul %93, %94, %cst_59 {dimension_numbers = #tpu.dot_dimension_numbers<[1], [0], [0], [1], [0, 0, 1, 1], [], []>} : vector<8x8xbf16>, vector<8x8xbf16>, vector<8x8xf32> -> vector<8x8xf32>
    %cst_60 = arith.constant -1.000000e+09 : f32
    %96 = vector.broadcast %cst_60 : f32 to vector<8x8xf32>
    %97 = arith.select %17, %96, %95 : vector<8x8xi1>, vector<8x8xf32>
    %cst_61 = arith.constant dense<0xFF800000> : vector<8xf32>
    %98 = vector.multi_reduction <maximumf>, %97, %cst_61 [1] : vector<8x8xf32> to vector<8xf32>
    %99 = vector.shape_cast %98 : vector<8xf32> to vector<8x1xf32>
    %100 = vector.broadcast %99 : vector<8x1xf32> to vector<8x8xf32>
    %101 = arith.subf %97, %100 : vector<8x8xf32>
    %102 = math.exp %101 : vector<8x8xf32>
    %cst_62 = arith.constant dense<0.000000e+00> : vector<8xf32>
    %103 = vector.multi_reduction <add>, %102, %cst_62 [1] : vector<8x8xf32> to vector<8xf32>
    %104 = vector.shape_cast %103 : vector<8xf32> to vector<8x1xf32>
    %cst_63 = arith.constant 1.000000e+00 : f32
    %105 = vector.broadcast %cst_63 : f32 to vector<8x1xf32>
    %106 = arith.divf %105, %104 : vector<8x1xf32>
    %107 = vector.broadcast %106 : vector<8x1xf32> to vector<8x8xf32>
    %108 = arith.mulf %102, %107 : vector<8x8xf32>
    %c0_64 = arith.constant 0 : index
    %c3 = arith.constant 3 : index
    %c0_65 = arith.constant 0 : index
    %c0_66 = arith.constant 0 : index
    %109 = vector.load %arg17[%c0_64, %c3, %c0_65, %c0_66] : memref<1x4x8x8xf32, #tpu.memory_space<vmem>>, vector<1x1x8x8xf32>
    %110 = vector.shape_cast %109 : vector<1x1x8x8xf32> to vector<8x8xf32>
    %111 = vector.shape_cast %108 : vector<8x8xf32> to vector<1x1x8x8xf32>
    tpu.vector_store %arg17[%c0_64, %c3, %c0_65, %c0_66], %111 {strides = array<i32>} : memref<1x4x8x8xf32, #tpu.memory_space<vmem>>, vector<1x1x8x8xf32>,
    %112 = arith.truncf %108 : vector<8x8xf32> to vector<8x8xbf16>
    %c3_67 = arith.constant 3 : index
    %c0_68 = arith.constant 0 : index
    %c0_69 = arith.constant 0 : index
    %113 = vector.load %arg19[%c3_67, %c0_68, %c0_69] : memref<4x8x8xbf16, #tpu.memory_space<vmem>>, vector<1x8x8xbf16>
    %114 = vector.shape_cast %113 : vector<1x8x8xbf16> to vector<8x8xbf16>
    %cst_70 = arith.constant dense<0.000000e+00> : vector<8x8xf32>
    %115 = tpu.matmul %112, %114, %cst_70 {dimension_numbers = #tpu.dot_dimension_numbers<[1], [0], [0], [1], [0, 0, 1, 1], [], []>} : vector<8x8xbf16>, vector<8x8xbf16>, vector<8x8xf32> -> vector<8x8xf32>
    %116 = arith.truncf %115 : vector<8x8xf32> to vector<8x8xbf16>
    %c0_71 = arith.constant 0 : index
    %c24_72 = arith.constant 24 : index
    %117 = vector.load %arg20[%c0_71, %c24_72] : memref<8x32xbf16, #tpu.memory_space<vmem>>, vector<8x8xbf16>
    tpu.vector_store %arg20[%c0_71, %c24_72], %116 {strides = array<i32>} : memref<8x32xbf16, #tpu.memory_space<vmem>>, vector<8x8xbf16>,
    %c0_73 = arith.constant 0 : index
    %c0_74 = arith.constant 0 : index
    %118 = vector.load %arg20[%c0_73, %c0_74] : memref<8x32xbf16, #tpu.memory_space<vmem>>, vector<8x32xbf16>
    %c0_75 = arith.constant 0 : index
    %c0_76 = arith.constant 0 : index
    %119 = vector.load %arg12[%c0_75, %c0_76] : memref<32x32xbf16, #tpu.memory_space<vmem>>, vector<32x32xbf16>
    %cst_77 = arith.constant dense<0.000000e+00> : vector<8x32xf32>
    %120 = tpu.matmul %118, %119, %cst_77 {dimension_numbers = #tpu.dot_dimension_numbers<[1], [0], [0], [1], [0, 0, 1, 1], [], []>} : vector<8x32xbf16>, vector<32x32xbf16>, vector<8x32xf32> -> vector<8x32xf32>
    %c0_78 = arith.constant 0 : index
    %c0_79 = arith.constant 0 : index
    %121 = vector.load %arg13[%c0_78, %c0_79] : memref<1x32xf32, #tpu.memory_space<vmem>>, vector<1x32xf32>
    %122 = vector.broadcast %121 : vector<1x32xf32> to vector<8x32xf32>
    %123 = arith.addf %120, %122 : vector<8x32xf32>
    %124 = arith.addf %123, %4 : vector<8x32xf32>
    %cst_80 = arith.constant dense<0.000000e+00> : vector<8xf32>
    %125 = vector.multi_reduction <add>, %124, %cst_80 [1] : vector<8x32xf32> to vector<8xf32>
    %126 = vector.shape_cast %125 : vector<8xf32> to vector<8x1xf32>
    %cst_81 = arith.constant 3.200000e+01 : f32
    %127 = vector.broadcast %cst_81 : f32 to vector<8x1xf32>
    %128 = arith.divf %126, %127 : vector<8x1xf32>
    %129 = vector.broadcast %128 : vector<8x1xf32> to vector<8x32xf32>
    %130 = arith.subf %124, %129 : vector<8x32xf32>
    %131 = arith.mulf %130, %130 : vector<8x32xf32>
    %cst_82 = arith.constant dense<0.000000e+00> : vector<8xf32>
    %132 = vector.multi_reduction <add>, %131, %cst_82 [1] : vector<8x32xf32> to vector<8xf32>
    %133 = vector.shape_cast %132 : vector<8xf32> to vector<8x1xf32>
    %cst_83 = arith.constant 3.200000e+01 : f32
    %134 = vector.broadcast %cst_83 : f32 to vector<8x1xf32>
    %135 = arith.divf %133, %134 : vector<8x1xf32>
    %136 = vector.broadcast %128 : vector<8x1xf32> to vector<8x32xf32>
    %137 = arith.subf %124, %136 : vector<8x32xf32>
    %cst_84 = arith.constant 9.99999974E-6 : f32
    %138 = vector.broadcast %cst_84 : f32 to vector<8x1xf32>
    %139 = arith.addf %135, %138 : vector<8x1xf32>
    %140 = math.rsqrt %139 : vector<8x1xf32>
    %141 = vector.broadcast %140 : vector<8x1xf32> to vector<8x32xf32>
    %142 = arith.mulf %137, %141 : vector<8x32xf32>
    %c0_85 = arith.constant 0 : index
    %c0_86 = arith.constant 0 : index
    %143 = vector.load %arg14[%c0_85, %c0_86] : memref<1x32xf32, #tpu.memory_space<vmem>>, vector<1x32xf32>
    %144 = vector.broadcast %143 : vector<1x32xf32> to vector<8x32xf32>
    %145 = arith.mulf %142, %144 : vector<8x32xf32>
    %c0_87 = arith.constant 0 : index
    %c0_88 = arith.constant 0 : index
    %146 = vector.load %arg15[%c0_87, %c0_88] : memref<1x32xf32, #tpu.memory_space<vmem>>, vector<1x32xf32>
    %147 = vector.broadcast %146 : vector<1x32xf32> to vector<8x32xf32>
    %148 = arith.addf %145, %147 : vector<8x32xf32>
    %c0_89 = arith.constant 0 : index
    %c0_90 = arith.constant 0 : index
    %c0_91 = arith.constant 0 : index
    %149 = vector.load %arg16[%c0_89, %c0_90, %c0_91] : memref<1x8x32xf32, #tpu.memory_space<vmem>>, vector<1x8x32xf32>
    %150 = vector.shape_cast %149 : vector<1x8x32xf32> to vector<8x32xf32>
    %151 = vector.shape_cast %148 : vector<8x32xf32> to vector<1x8x32xf32>
    tpu.vector_store %arg16[%c0_89, %c0_90, %c0_91], %151 {strides = array<i32>} : memref<1x8x32xf32, #tpu.memory_space<vmem>>, vector<1x8x32xf32>,
    return
  }
  func.func @transform_0(%arg0: i32, %arg1: i32) -> (i32, i32, i32) {
    %c0_i32 = arith.constant 0 : i32
    %c0_i32_0 = arith.constant 0 : i32
    return %arg0, %arg1, %c0_i32 : i32, i32, i32
  }
  func.func @transform_1(%arg0: i32, %arg1: i32) -> (i32, i32, i32) {
    %c0_i32 = arith.constant 0 : i32
    %c0_i32_0 = arith.constant 0 : i32
    %c0_i32_1 = arith.constant 0 : i32
    return %arg0, %c0_i32, %c0_i32_0 : i32, i32, i32
  }
  func.func @transform_2(%arg0: i32, %arg1: i32) -> (i32, i32, i32) {
    %c0_i32 = arith.constant 0 : i32
    %c0_i32_0 = arith.constant 0 : i32
    %c0_i32_1 = arith.constant 0 : i32
    return %arg0, %c0_i32, %c0_i32_0 : i32, i32, i32
  }
  func.func @transform_3(%arg0: i32, %arg1: i32) -> (i32, i32, i32) {
    %c0_i32 = arith.constant 0 : i32
    %c0_i32_0 = arith.constant 0 : i32
    return %arg0, %arg1, %c0_i32 : i32, i32, i32
  }
  func.func @transform_4(%arg0: i32, %arg1: i32) -> (i32, i32) {
    %c0_i32 = arith.constant 0 : i32
    %c0_i32_0 = arith.constant 0 : i32
    %c0_i32_1 = arith.constant 0 : i32
    return %c0_i32, %c0_i32_0 : i32, i32
  }
  func.func @transform_5(%arg0: i32, %arg1: i32) -> (i32, i32) {
    %c0_i32 = arith.constant 0 : i32
    %c0_i32_0 = arith.constant 0 : i32
    %c0_i32_1 = arith.constant 0 : i32
    return %c0_i32, %c0_i32_0 : i32, i32
  }
  func.func @transform_6(%arg0: i32, %arg1: i32) -> (i32, i32) {
    %c0_i32 = arith.constant 0 : i32
    %c0_i32_0 = arith.constant 0 : i32
    %c0_i32_1 = arith.constant 0 : i32
    return %c0_i32, %c0_i32_0 : i32, i32
  }
  func.func @transform_7(%arg0: i32, %arg1: i32) -> (i32, i32) {
    %c0_i32 = arith.constant 0 : i32
    %c0_i32_0 = arith.constant 0 : i32
    %c0_i32_1 = arith.constant 0 : i32
    return %c0_i32, %c0_i32_0 : i32, i32
  }
  func.func @transform_8(%arg0: i32, %arg1: i32) -> (i32, i32) {
    %c0_i32 = arith.constant 0 : i32
    %c0_i32_0 = arith.constant 0 : i32
    %c0_i32_1 = arith.constant 0 : i32
    return %c0_i32, %c0_i32_0 : i32, i32
  }
  func.func @transform_9(%arg0: i32, %arg1: i32) -> (i32, i32) {
    %c0_i32 = arith.constant 0 : i32
    %c0_i32_0 = arith.constant 0 : i32
    %c0_i32_1 = arith.constant 0 : i32
    return %c0_i32, %c0_i32_0 : i32, i32
  }
  func.func @transform_10(%arg0: i32, %arg1: i32) -> (i32, i32) {
    %c0_i32 = arith.constant 0 : i32
    %c0_i32_0 = arith.constant 0 : i32
    %c0_i32_1 = arith.constant 0 : i32
    return %c0_i32, %c0_i32_0 : i32, i32
  }
  func.func @transform_11(%arg0: i32, %arg1: i32) -> (i32, i32) {
    %c0_i32 = arith.constant 0 : i32
    %c0_i32_0 = arith.constant 0 : i32
    %c0_i32_1 = arith.constant 0 : i32
    return %c0_i32, %c0_i32_0 : i32, i32
  }
  func.func @transform_12(%arg0: i32, %arg1: i32) -> (i32, i32) {
    %c0_i32 = arith.constant 0 : i32
    %c0_i32_0 = arith.constant 0 : i32
    %c0_i32_1 = arith.constant 0 : i32
    return %c0_i32, %c0_i32_0 : i32, i32
  }
  func.func @transform_13(%arg0: i32, %arg1: i32) -> (i32, i32) {
    %c0_i32 = arith.constant 0 : i32
    %c0_i32_0 = arith.constant 0 : i32
    %c0_i32_1 = arith.constant 0 : i32
    return %c0_i32, %c0_i32_0 : i32, i32
  }
  func.func @transform_14(%arg0: i32, %arg1: i32) -> (i32, i32, i32) {
    %c0_i32 = arith.constant 0 : i32
    %c0_i32_0 = arith.constant 0 : i32
    return %arg0, %arg1, %c0_i32 : i32, i32, i32
  }
  func.func @transform_15(%arg0: i32, %arg1: i32) -> (i32, i32, i32, i32) {
    %c0_i32 = arith.constant 0 : i32
    %c0_i32_0 = arith.constant 0 : i32
    %c0_i32_1 = arith.constant 0 : i32
    return %arg0, %c0_i32, %arg1, %c0_i32_0 : i32, i32, i32, i32
  }
}

</mosaic_0001>

<bundles_post_ra>
// kernel: tpu_custom_call.1
= control target key start
LH: loop header
LB: loop body
LE: loop exit
PB: predicated region body
PF: predicated region fallthrough
CT: control target
= control target key end

     0   :  { %s3072_s0 = inlined_call_operand.hbm [shape: f32[2,8,32], index: 0, kind: input, shape index: {}]   ;;  %s3073_s1 = inlined_call_operand.hbm [shape: bf16[2,8,32], index: 1, kind: input, shape index: {}]   ;;  %s3074_s2 = inlined_call_operand.hbm [shape: bf16[2,8,32], index: 2, kind: input, shape index: {}]   ;;  %s3075_s3 = inlined_call_operand.hbm [shape: s8[2,8,8], index: 3, kind: input, shape index: {}]   ;;  %s3076_s4 = inlined_call_operand.hbm [shape: bf16[32,32], index: 4, kind: input, shape index: {}]   ;;  %s3077_s5 = inlined_call_operand.vmem [shape: f32[1,32], index: 5, kind: input, shape index: {}]   ;;  %s3078_s6 = inlined_call_operand.vmem [shape: bf16[32,32], index: 6, kind: input, shape index: {}]   ;;  %s3079_s7 = inlined_call_operand.vmem [shape: f32[1,32], index: 7, kind: input, shape index: {}]   ;;  %s3080_s8 = inlined_call_operand.hbm [shape: bf16[32,32], index: 8, kind: input, shape index: {}]   ;;  %s3081_s9 = inlined_call_operand.hbm [shape: f32[1,32], index: 9, kind: input, shape index: {}]   ;;  %s3082_s10 = inlined_call_operand.vmem [shape: bf16[32,32], index: 10, kind: input, shape index: {}]   ;;  %s3083_s11 = inlined_call_operand.vmem [shape: f32[1,32], index: 11, kind: input, shape index: {}]   ;;  %s3084_s12 = inlined_call_operand.vmem [shape: f32[1,32], index: 12, kind: input, shape index: {}]   ;;  %s3085_s13 = inlined_call_operand.vmem [shape: f32[1,32], index: 13, kind: input, shape index: {}]   ;;  %s3086_s14 = inlined_call_operand.hbm [shape: f32[2,8,32], index: 14, kind: output, shape index: {0}]   ;;  %s3087_s15 = inlined_call_operand.hbm [shape: f32[2,4,8,8], index: 15, kind: output, shape index: {1}]  }
   0x1   :  { %3113 = sst [smem:[#allocation31_spill]] %s3072_s0 }
   0x2   :  { %3114 = sst [smem:[#allocation32_spill]] %s3073_s1 }
   0x3   :  { %3115 = sst [smem:[#allocation33_spill]] %s3075_s3 }
   0x4   :  { %3116 = sst [smem:[#allocation34_spill]] %s3077_s5 }
   0x5   :  { %3117 = sst [smem:[#allocation35_spill]] %s3078_s6 }
   0x6   :  { %3118 = sst [smem:[#allocation36_spill]] %s3079_s7 }
   0x7   :  { %3119 = sst [smem:[#allocation37_spill]] %s3082_s10 }
   0x8   :  { %3120 = sst [smem:[#allocation38_spill]] %s3083_s11 }
   0x9   :  { %3121 = sst [smem:[#allocation39_spill]] %s3084_s12 }
   0xa   :  { %3122 = sst [smem:[#allocation40_spill]] %s3085_s13 }
   0xb   :  { %3123 = sst [smem:[#allocation41_spill]] %s3086_s14 }
   0xc   :  { %3124 = sst [smem:[#allocation42_spill]] %s3087_s15 }
   0xd   :  { %21 = vsyncpa [#allocation6], 0 }
   0xe   :  { %23 = vsyncpa [#allocation6 + $0x1], 0 }
   0xf   :  { %24 = vsyncpa [#allocation9], 0 }
  0x10   :  { %25 = vsyncpa [#allocation12], 0 }
  0x11   :  { %27 = vsyncpa [#allocation12 + $0x1], 0 }
  0x12   :  { %28 = vsyncpa [#allocation15], 0 }
  0x13   :  { %29 = vsyncpa [#allocation7], 0 }
  0x14   :  { %31 = vsyncpa [#allocation7 + $0x1], 0 }
  0x15   :  { %32 = vsyncpa [#allocation19], 0 }
  0x16   :  { %34 = vsyncpa [#allocation19 + $0x1], 0  ;;  %s2510_s18 = smov 0   ;;  %s2512_s19 = smov 0  }
  0x17   :  { %s2514_s20 = smov 0   ;;  %s2516_s21 = smov 0  }
  0x18   :  { %s2518_s22 = smov 0   ;;  %s2520_s23 = smov 0  }
  0x19 LB: > { %3125 = sst [smem:[#allocation27_spill]] %s2387_s18  ;;  %s2541_s24 = sadd.s32 4294967295, %s2407_s23   ;;  %s2407_s23 = sphi %s2520_s23, %s40_s23   ;;  %s2403_s22 = sphi %s2518_s22, %s3176_s22   ;;  %s2399_s21 = sphi %s2516_s21, %s3175_s21   ;;  %s2395_s20 = sphi %s2514_s20, %s3174_s20   ;;  %s2391_s19 = sphi %s2512_s19, %s3173_s19   ;;  %s2387_s18 = sphi %s2510_s18, %s3172_s18  }
  0x1a   : > { %s1747_s25 = sadd.s32 4294967294, %s2407_s23   ;;  %p74_p0 = scmp.ne.s32.totalorder %s2391_s19, %s2387_s18 }
  0x1b   : > { %p3093_p1 = scmp.eq.s32.totalorder %s2541_s24, 0  ;;  %p396_p3 = scmp.eq.s32.totalorder %s1747_s25, 1 }
  0x1c   : > { %p1748_p5 = scmp.ge.s32.totalorder %s2407_s23, 1  ;;  %p431_p7 = scmp.lt.s32.totalorder %s2407_s23, 3 }
  0x1d   : > { %p2550_p4 = por %p3093_p1, %p74_p0  ;;  %p2555_p6 = por %p396_p3, %p74_p0 }
  0x1e   : > { %s3090_s28 = sshll.u32 %s2399_s21, 6  ;;  %p2561_p8 = pnand %p1748_p5, %p431_p7 }
  0x1f   : > { %s3126_s26 = scalar_select %p2550_p4, 1, 0 }
  0x20   : > { %s3128_s27 = scalar_select %p2555_p6, 1, 0 }
  0x21   : > { %3127 = sst [smem:[#allocation28_spill]] %s3126_s26  ;;  %s3132_s1 = sld [smem:[#allocation32_spill]] }
  0x22   : > { %3129 = sst [smem:[#allocation29_spill]] %s3128_s27  ;;  %s2409_s25 = smov [#allocation8]  }
  0x23   : > { %s3130_s29 = scalar_select %p2561_p8, 1, 0 }
  0x24   : > { %s446_s18 = sshll.u32 %s2409_s25, 4  ;;  %p1944_p9 = pneg %p2561_p8  ;;  %s2574_s18 = int_to_ptr.vmem [resolvable:$true] %s446_s18 }
  0x25   : > { %3131 = sst [smem:[#allocation30_spill]] %s3130_s29  ;;  %s2410_s30 = smov [#allocation13]  }
  0x26   : > { %p2579_p11 = pnand %p1944_p9, %p2550_p4  ;;  %s469_s16 = sshll.u32 %s2410_s30, 4  ;;  %s2583_s16 = int_to_ptr.vmem [resolvable:$true] %s469_s16 }
  0x27   : > { %s2570_s17 = scalar_lea.hbm %s3132_s1, %s3090_s28  ;;  %p2587_p12 = pnand %p1944_p9, %p3093_p1 }
  0x28   : > { %s3133_s27 = scalar_select %p2579_p11, 1, 0 }
  0x29   : > { %s3134_s25 = scalar_select %p2587_p12, 1, 0 }
  0x2a   : > { %s2073_s28 = scalar_lea.hbm %s2570_s17, 64  ;;  %p3105_p0 = pneg %p2579_p11 }
  0x2b   : > { %p2074_p13 = scmp.ne.s32.totalorder %s2570_s17, %s2073_s28  ;;  %s2078_s12 = scalar_lea.hbm %s3132_s1, 128 }
  0x2c   : > { %p2079_p7 = scmp.lt.u32.totalorder %s2570_s17, %s3132_s1  ;;  %p2080_p9 = scmp.lt.u32.totalorder %s2078_s12, %s2073_s28 }
  0x2d   : > { %p2076_p3 = pnand %p3105_p0, %p2074_p13  ;;  %p2082_p1 = scmp.lt.u32.totalorder %s2073_s28, %s2570_s17 }
  0x2e   : > { %p2081_p10 = por %p2080_p9, %p2079_p7 }
  0x2f   : > { %p2077_p5 = pneg %p2076_p3 }
  0x30   : > { %p2083_p2 = por %p2082_p1, %p2081_p10 }
  0x32   : > { %p2084_p6 = pnand %p2083_p2, %p2077_p5 }
  0x34   : > { %2087 = shalt.err (!%p2084_p6)
}
  0x35   : > { %s2088_s11 = scalar_lea.vmem %s2574_s18, 64  ;;  %p2096_p8 = scmp.lt.s32.totalorder %s2574_s18, %s2574_s18 }
  0x36   : > { %p2089_p13 = scmp.ne.s32.totalorder %s2574_s18, %s2088_s11  ;;  %p2097_p12 = scmp.lt.s32.totalorder %s2088_s11, %s2088_s11 }
  0x38   : > { %p2091_p3 = pnand %p2089_p13, %p3105_p0  ;;  %p2098_p7 = por %p2097_p12, %p2096_p8 }
  0x3a   : > { %p2092_p4 = pneg %p2091_p3 }
  0x3c   : > { %p2099_p9 = pnand %p2098_p7, %p2092_p4 }
  0x3e   : > { %2102 = shalt.err (!%p2099_p9)
}
  0x3f   : > { %1947 = dma.hbm_to_vmem [thread:$0]  (!%p2579_p11), %s2570_s17, 64, %s2574_s18, [#allocation9]  }
  0x40   : > { %s2103_s14 = scalar_lea.hbm %s3076_s4, 256  ;;  %p3135_p2 = scmp.ne.s32.totalorder %s3134_s25, 0 }
  0x41   : > { %p2104_p1 = scmp.ne.s32.totalorder %s3076_s4, %s2103_s14  ;;  %p2110_p10 = scmp.lt.u32.totalorder %s2103_s14, %s3076_s4 }
  0x42   : > { %p2625_p6 = pneg %p3135_p2 }
  0x44   : > { %s3136_s11 = scalar_select %p2625_p6, 1, 0 }
  0x45   : > { %p2106_p4 = pnand %p2625_p6, %p2104_p1 }
  0x47   : > { %p2107_p8 = pneg %p2106_p4 }
  0x49   : > { %p2112_p12 = pnand %p2110_p10, %p2107_p8 }
  0x4b   : > { %2115 = shalt.err (!%p2112_p12)
}
  0x4c   : > { %s2116_s18 = scalar_lea.vmem %s2583_s16, 256  ;;  %p2124_p7 = scmp.lt.s32.totalorder %s2583_s16, %s2583_s16 }
  0x4d   : > { %p2117_p5 = scmp.ne.s32.totalorder %s2583_s16, %s2116_s18  ;;  %p2125_p9 = scmp.lt.s32.totalorder %s2116_s18, %s2116_s18 }
  0x4f   : > { %p2119_p13 = pnand %p2117_p5, %p2625_p6  ;;  %p2126_p1 = por %p2125_p9, %p2124_p7 }
  0x51   : > { %p2120_p3 = pneg %p2119_p13 }
  0x53   : > { %p2127_p4 = pnand %p2126_p1, %p2120_p3 }
  0x55   : > { %2130 = shalt.err (!%p2127_p4)
}
  0x56   : > { %s2411_s17 = smov 64   ;;  %s2412_s1 = smov 4  }
  0x57   : > { %1953 = dma.hbm_to_vmem [thread:$0]  (!%p3135_p2), %s3076_s4, 256, %s2583_s16, [#allocation12], %s2411_s17, %s2411_s17, %s2412_s1  }
  0x58   : > { %s3137_s14 = sshll.u32 %s2399_s21, 6  ;;  %s2413_s18 = smov [#allocation14]  }
  0x59   : > { %s2651_s30 = scalar_lea.hbm %s3074_s2, %s3137_s14  ;;  %s491_s10 = sshll.u32 %s2413_s18, 4  ;;  %s492_s10 = int_to_ptr.vmem [resolvable:$true] %s491_s10 }
  0x5a   : > { %s2414_s5 = smov [#allocation10]   ;;  %s2131_s29 = scalar_lea.hbm %s3080_s8, 256 }
  0x5b   : > { %s459_s7 = sshll.u32 %s2414_s5, 4  ;;  %p2132_p8 = scmp.ne.s32.totalorder %s3080_s8, %s2131_s29  ;;  %s460_s7 = int_to_ptr.vmem [resolvable:$true] %s459_s7 }
  0x5c   : > { %p2138_p5 = scmp.lt.u32.totalorder %s2131_s29, %s3080_s8 }
  0x5d   : > { %p2134_p10 = pnand %p2132_p8, %p2625_p6 }
  0x5f   : > { %p2135_p12 = pneg %p2134_p10 }
  0x61   : > { %p2140_p13 = pnand %p2138_p5, %p2135_p12 }
  0x63   : > { %2143 = shalt.err (!%p2140_p13)
}
  0x64   : > { %s2144_s13 = scalar_lea.vmem %s492_s10, 256  ;;  %p2152_p1 = scmp.lt.s32.totalorder %s492_s10, %s492_s10 }
  0x65   : > { %p2145_p3 = scmp.ne.s32.totalorder %s492_s10, %s2144_s13  ;;  %p2153_p4 = scmp.lt.s32.totalorder %s2144_s13, %s2144_s13 }
  0x67   : > { %p2147_p7 = pnand %p2145_p3, %p2625_p6  ;;  %p2154_p0 = por %p2153_p4, %p2152_p1 }
  0x69   : > { %p2148_p9 = pneg %p2147_p7 }
  0x6b   : > { %p2155_p11 = pnand %p2154_p0, %p2148_p9 }
  0x6d   : > { %2158 = shalt.err (!%p2155_p11)
}
  0x6e   : > { %1956 = dma.hbm_to_vmem [thread:$0]  (!%p3135_p2), %s3080_s8, 256, %s492_s10, [#allocation15], %s2411_s17, %s2411_s17, %s2412_s1  }
  0x6f   : > { %s2159_s5 = scalar_lea.hbm %s2651_s30, 64  ;;  %p3138_p10 = scmp.ne.s32.totalorder %s3133_s27, 0 }
  0x70   : > { %p2160_p8 = scmp.ne.s32.totalorder %s2651_s30, %s2159_s5  ;;  %s2164_s29 = scalar_lea.hbm %s3074_s2, 128 }
  0x71   : > { %p3139_p12 = pneg %p3138_p10  ;;  %p2165_p11 = scmp.lt.u32.totalorder %s2651_s30, %s3074_s2 }
  0x72   : > { %p2166_p0 = scmp.lt.u32.totalorder %s2164_s29, %s2159_s5  ;;  %p2168_p7 = scmp.lt.u32.totalorder %s2159_s5, %s2651_s30 }
  0x73   : > { %p2162_p5 = pnand %p2160_p8, %p3139_p12 }
  0x74   : > { %p2167_p3 = por %p2166_p0, %p2165_p11 }
  0x75   : > { %p2163_p13 = pneg %p2162_p5 }
  0x76   : > { %p2169_p9 = por %p2168_p7, %p2167_p3 }
  0x78   : > { %p2170_p1 = pnand %p2169_p9, %p2163_p13 }
  0x7a   : > { %2173 = shalt.err (!%p2170_p1)
}
  0x7b   : > { %s2174_s10 = scalar_lea.vmem %s460_s7, 64  ;;  %p3140_p8 = pmov %p3139_p12 }
  0x7c   : > { %p2175_p4 = scmp.ne.s32.totalorder %s460_s7, %s2174_s10  ;;  %p2182_p2 = scmp.lt.s32.totalorder %s460_s7, %s460_s7 }
  0x7d   : > { %p2183_p6 = scmp.lt.s32.totalorder %s2174_s10, %s2174_s10 }
  0x7e   : > { %p2177_p12 = pnand %p2175_p4, %p3140_p8 }
  0x7f   : > { %p2184_p0 = por %p2183_p6, %p2182_p2 }
  0x80   : > { %p2178_p5 = pneg %p2177_p12 }
  0x82   : > { %p2185_p11 = pnand %p2184_p0, %p2178_p5 }
  0x84   : > { %2188 = shalt.err (!%p2185_p11)
}
  0x85   : > { %1950 = dma.hbm_to_vmem [thread:$0]  (!%p3138_p10), %s2651_s30, 64, %s460_s7, [#allocation9]  }
  0x86   : > { %s2415_s17 = smov [#allocation16]   ;;  %s2189_s16 = scalar_lea.hbm %s3081_s9, 16 }
  0x87   : > { %s505_s1 = sshll.u32 %s2415_s17, 4  ;;  %p2190_p13 = scmp.ne.s32.totalorder %s3081_s9, %s2189_s16  ;;  %s506_s1 = int_to_ptr.vmem [resolvable:$true] %s505_s1 }
  0x88   : > { %p3141_p3 = scmp.ne.s32.totalorder %s3136_s11, 0  ;;  %p2196_p7 = scmp.lt.u32.totalorder %s2189_s16, %s3081_s9 }
  0x8a   : > { %p2192_p2 = pnand %p2190_p13, %p3141_p3 }
  0x8c   : > { %p2193_p6 = pneg %p2192_p2 }
  0x8e   : > { %p2198_p9 = pnand %p2196_p7, %p2193_p6 }
  0x90   : > { %2201 = shalt.err (!%p2198_p9)
}
  0x91   : > { %s2202_s7 = scalar_lea.vmem %s506_s1, 16  ;;  %s2209_s27 = scalar_lea.vmem %s506_s1, 32 }
  0x92   : > { %p2203_p10 = scmp.ne.s32.totalorder %s506_s1, %s2202_s7  ;;  %p2210_p8 = scmp.lt.s32.totalorder %s506_s1, %s506_s1 }
  0x93   : > { %p2211_p12 = scmp.lt.s32.totalorder %s2209_s27, %s2202_s7 }
  0x94   : > { %p2205_p1 = pnand %p2203_p10, %p3141_p3 }
  0x95   : > { %p2212_p5 = por %p2211_p12, %p2210_p8 }
  0x96   : > { %p2206_p4 = pneg %p2205_p1 }
  0x98   : > { %p2213_p0 = pnand %p2212_p5, %p2206_p4 }
  0x9a   : > { %2216 = shalt.err (!%p2213_p0)
}
  0x9b   : > { %p3142_p11 = scmp.ne.s32.totalorder %s3134_s25, 0  ;;  %s52_s11 = sadd.s32 1, %s2403_s22 }
  0x9c   : > { %s61_s6 = sadd.s32 1, %s2395_s20  ;;  %p54_p13 = scmp.ge.s32.totalorder %s52_s11, 2 }
  0x9d   : > { %1959 = dma.hbm_to_vmem [thread:$0]  (!%p3142_p11), %s3081_s9, 16, %s506_s1, [#allocation15]  }
  0x9e   : > { %p68_p3 = scmp.ne.s32.totalorder %s2395_s20, %s2391_s19  ;;  %p69_p2 = scmp.eq.s32.totalorder %s2407_s23, 0 }
  0x9f   : > { %p1977_p6 = scmp.lt.s32.totalorder %s2407_s23, 2  ;;  %s3178_s11 = smov (%p54_p13, %s52_s11), 0 }
  0xa0   : > { %p70_p7 = por %p69_p2, %p68_p3  ;;  %p3143_p9 = scmp.eq.s32.totalorder %s2541_s24, 1 }
  0xa1   : > { %s56_s26 = ssub.s32 %s2403_s22, %s3178_s11  ;;  %s2725_s29 = sand.u32 1, %s2395_s20  }
  0xa2   : > { %p2718_p10 = por %p3143_p9, %p68_p3  ;;  %p59_p1 = scmp.eq.s32.totalorder %s56_s26, 0 }
  0xa3   : > { %s1755_s14 = sshll.u32 %s2725_s29, 3  ;;  %s1756_s15 = sshll.u32 %s2403_s22, 7 }
  0xa4   : > { %s3144_s25 = scalar_select %p2718_p10, 1, 0 }
  0xa5   : > { %s2730_s10 = scalar_select %p59_p1, %s2395_s20, %s61_s6  }
  0xa6   : > { %s3145_s28 = sld [smem:[#allocation31_spill]]  ;;  %s532_s16 = scalar_lea.vmem [#allocation5], %s1755_s14 }
  0xa7   : > { %s540_s12 = sshll.u32 %s532_s16, 4  ;;  %p2739_p4 = pnand %p1977_p6, %p70_p7  ;;  %s2743_s12 = int_to_ptr.vmem [resolvable:$true] %s540_s12 }
  0xa8   : > { %s547_s0 = sand.u32 1, %s2407_s23   ;;  %s529_s3 = scalar_lea.sflag [#allocation6], %s2725_s29 }
  0xa9   : > { %p2219_p12 = pneg %p2739_p4 }
  0xac   : > { %s2735_s18 = scalar_lea.hbm %s3145_s28, %s1756_s15  ;;  %s2222_s5 = scalar_lea.hbm %s3145_s28, 256 }
  0xad   : > { %s2217_s7 = scalar_lea.hbm %s2735_s18, 128  ;;  %p2223_p11 = scmp.lt.u32.totalorder %s2735_s18, %s3145_s28 }
  0xae   : > { %p2218_p8 = scmp.ne.s32.totalorder %s2735_s18, %s2217_s7  ;;  %p2224_p13 = scmp.lt.u32.totalorder %s2222_s5, %s2217_s7 }
  0xaf   : > { %p2226_p2 = scmp.lt.u32.totalorder %s2217_s7, %s2735_s18 }
  0xb0   : > { %p2220_p5 = pnand %p2219_p12, %p2218_p8  ;;  %p2225_p3 = por %p2224_p13, %p2223_p11 }
  0xb2   : > { %p2221_p0 = pneg %p2220_p5  ;;  %p2227_p6 = por %p2226_p2, %p2225_p3 }
  0xb4   : > { %p2228_p7 = pnand %p2227_p6, %p2221_p0 }
  0xb6   : > { %2231 = shalt.err (!%p2228_p7)
}
  0xb7   : > { %s2232_s14 = scalar_lea.vmem %s2743_s12, 128  ;;  %s2416_s15 = smov [#allocation5]  }
  0xb8   : > { %p2233_p9 = scmp.ne.s32.totalorder %s2743_s12, %s2232_s14  ;;  %s2237_s17 = sshll.u32 %s2416_s15, 4  ;;  %s2238_s17 = int_to_ptr.vmem [resolvable:$false] %s2237_s17 }
  0xb9   : > { %s2239_s1 = scalar_lea.vmem %s2238_s17, 256  ;;  %p2240_p5 = scmp.lt.s32.totalorder %s2743_s12, %s2238_s17 }
  0xba   : > { %p2235_p1 = pnand %p2233_p9, %p2219_p12  ;;  %p2241_p11 = scmp.lt.s32.totalorder %s2239_s1, %s2232_s14 }
  0xbc   : > { %p2236_p8 = pneg %p2235_p1  ;;  %p2242_p13 = por %p2241_p11, %p2240_p5 }
  0xbe   : > { %p2243_p3 = pnand %p2242_p13, %p2236_p8 }
  0xc0   : > { %2246 = shalt.err (!%p2243_p3)
}
  0xc1   : > { %1963 = dma.hbm_to_vmem [thread:$0]  (!%p2739_p4), %s2735_s18, 128, %s2743_s12, %s529_s3  }
  0xc2   : > { %s1757_s16 = sshll.u32 %s2725_s29, 1  ;;  %s1758_s7 = sshll.u32 %s2403_s22, 5 }
  0xc3   : > { %s3147_s5 = sld [smem:[#allocation33_spill]]  ;;  %s551_s26 = scalar_lea.vmem [#allocation11], %s1757_s16 }
  0xc4   : > { %s559_s14 = sshll.u32 %s551_s26, 4  ;;  %s548_s15 = scalar_lea.sflag [#allocation12], %s547_s0  ;;  %s560_s14 = int_to_ptr.vmem [resolvable:$true] %s559_s14 }
  0xc9   : > { %s2777_s6 = scalar_lea.hbm %s3147_s5, %s1758_s7  ;;  %s2252_s12 = scalar_lea.hbm %s3147_s5, 64 }
  0xca   : > { %s2247_s17 = scalar_lea.hbm %s2777_s6, 32  ;;  %p2253_p7 = scmp.lt.u32.totalorder %s2777_s6, %s3147_s5 }
  0xcb   : > { %p2248_p0 = scmp.ne.s32.totalorder %s2777_s6, %s2247_s17  ;;  %p2254_p9 = scmp.lt.u32.totalorder %s2252_s12, %s2247_s17 }
  0xcc   : > { %p2256_p8 = scmp.lt.u32.totalorder %s2247_s17, %s2777_s6 }
  0xcd   : > { %p2250_p2 = pnand %p2248_p0, %p2219_p12  ;;  %p2255_p1 = por %p2254_p9, %p2253_p7 }
  0xcf   : > { %p2251_p6 = pneg %p2250_p2  ;;  %p2257_p5 = por %p2256_p8, %p2255_p1 }
  0xd1   : > { %p2258_p11 = pnand %p2257_p5, %p2251_p6 }
  0xd3   : > { %2261 = shalt.err (!%p2258_p11)
}
  0xd4   : > { %s2262_s0 = scalar_lea.vmem %s560_s14, 32  ;;  %s2417_s16 = smov [#allocation11]  }
  0xd5   : > { %p2263_p13 = scmp.ne.s32.totalorder %s560_s14, %s2262_s0  ;;  %s2267_s7 = sshll.u32 %s2417_s16, 4  ;;  %s2268_s7 = int_to_ptr.vmem [resolvable:$false] %s2267_s7 }
  0xd6   : > { %s2269_s27 = scalar_lea.vmem %s2268_s7, 64  ;;  %p2270_p2 = scmp.lt.s32.totalorder %s560_s14, %s2268_s7 }
  0xd7   : > { %p2265_p3 = pnand %p2263_p13, %p2219_p12  ;;  %p2271_p10 = scmp.lt.s32.totalorder %s2269_s27, %s2262_s0 }
  0xd9   : > { %p2266_p0 = pneg %p2265_p3  ;;  %p2272_p7 = por %p2271_p10, %p2270_p2 }
  0xdb   : > { %p2273_p9 = pnand %p2272_p7, %p2266_p0 }
  0xdd   : > { %2276 = shalt.err (!%p2273_p9)
}
  0xde   : > { %1966 = dma.hbm_to_vmem [thread:$0]  (!%p2739_p4), %s2777_s6, 32, %s560_s14, %s548_s15  }
  0xdf   : > { %s3148_s30 = sld [smem:[#allocation30_spill]] }
  0xe5   : > { %p3149_p6 = scmp.ne.s32.totalorder %s3148_s30, 0 }
  0xe6   : > { %s3150_s26 = sld [smem:[#allocation28_spill]] (!%p3149_p6)  ;;  %s2803_s17 = sand.u32 (!%p3149_p6), 1, %s2391_s19  }
  0xe7   : > { %568 = sbr.rel (%p3149_p6) target bundleno = 2100 (0x834), region = 76  ;;  %s1760_s29 = sshll.u32 (!%p3149_p6), %s2803_s17, 3 }
  0xe8   : > { %s571_s18 = scalar_lea.sflag (!%p3149_p6), [#allocation6], %s2803_s17  ;;  %s2809_s12 = scalar_lea.vmem (!%p3149_p6), [#allocation5], %s1760_s29 }
  0xec   : > { %p3151_p10 = scmp.ne.s32.totalorder (!%p3149_p6), %s3150_s26, 0 }
  0xee   : > { %2358 = dma.done.wait (%p3151_p10), %s571_s18, 128  }
  0xef   : > { %2360 = vsyncadd (%p3151_p10), %s571_s18, 4294967168 }
  0xf0   : > { %2362 = dma.done.wait (%p3151_p10), [#allocation9], 128  }
  0xf1   : > { %2364 = vsyncadd (%p3151_p10), [#allocation9], 4294967168  ;;  %s587_s13 = sand.u32 1, %s2541_s24   ;;  %s1761_s6 = sshll.u32 %s2803_s17, 1 }
  0xf2   : > { %s588_s14 = scalar_lea.sflag [#allocation12], %s587_s13  ;;  %s2821_s15 = scalar_lea.vmem [#allocation11], %s1761_s6 }
  0xf3   : > { %2366 = dma.done.wait (%p3151_p10), %s588_s14, 32  }
  0xf4   : > { %2368 = vsyncadd (%p3151_p10), %s588_s14, 4294967264  ;;  %p3152_p4 = scmp.eq.s32.totalorder %s2541_s24, 0 }
  0xf6   : > { %2370 = dma.done.wait (%p3152_p4), [#allocation12], 256   ;;  %p3153_p12 = pmov %p3152_p4 }
  0xf7   : > { %p3154_p1 = pmov %p3152_p4 }
  0xf8   : > { %2372 = vsyncadd (%p3153_p12), [#allocation12], 4294967040 }
  0xf9   : > { %2374 = dma.done.wait (%p3154_p1), [#allocation15], 272   ;;  %p3155_p8 = pmov %p3154_p1 }
  0xfa   : > { %v2418_v0 = vmov 0.0   ;;  %vm2419_vm0 = vmmov 0   ;;  %s3156_s0 = sld [smem:[#allocation35_spill]]  ;;  %v667_v3 = vld [vmem:[#allocation8] sm:$0xf]  ;;  %vm692_vm1 = vcmask 261120  }
  0xfb   : > { %2376 = vsyncadd (%p3155_p8), [#allocation15], 4294967024  ;;  %1840 = vmatprep.subr.bf16.mxu0 %v2418_v0  ;;  %1844 = vmatprep.mubr.msk.bf16.mxu0 %vm2419_vm0, %v2418_v0  ;;  %v2049_v4 = vld [vmem:[#allocation13] sm:$0xff]   ;;  %v2050_v5 = vld [vmem:[#allocation13 + $0x8] sm:$0xff]   ;;  %s3157_s30 = sld [smem:[#allocation36_spill]]  ;;  %s2420_s13 = smov 112  }
  0xfc   : > { %1848 = vmatprep.subr.bf16.mxu1 %v2418_v0  ;;  %1852 = vmatprep.mubr.msk.bf16.mxu1 %vm2419_vm0, %v2418_v0  ;;  %v2853_v6 = vld [vmem:[%s2809_s12] sm:$0xff]  ;;  %s3158_s12 = sld [smem:[#allocation34_spill]]  ;;  %v2052_v16 = vld [vmem:[#allocation14 + $0x8] sm:$0xff]   ;;  %s2421_s6 = smov 104   ;;  %vm836_vm2 = vcmask 64512   ;;  %vm938_vm3 = vcmask 1043456  }
  0xfd   : > { %v861_v7 = vpack.c.bf16 %v2853_v6, %v2853_v6  ;;  %v2051_v13 = vld [vmem:[#allocation14] sm:$0xff]   ;;  %v668_v21 = vld [vmem:[#allocation10] sm:$0xf]  ;;  %s2422_s14 = smov 120   ;;  %v1771_v44 = vld [vmem:[#allocation16] ss:$0 sm:$0xff] }
  0xfe   : > { %1849 = vmatpush3.bf16.msra.mxu1 %v2051_v13  ;;  %vm840_vm4 = vcmask 60416   ;;  %v931_v53 = vld [vmem:[%s2821_s15] sm:$0x3]  ;;  %v2423_v54 = vmov 0   ;;  %s1766_s15 = sshll.u32 %s2803_s17, 5  ;;  %s2424_s1 = smov 8  }
  0xff   : > { %1850 = vmatprep.subr.bf16.mxu1 %v2418_v0  ;;  %vm932_vm5 = vnez %v931_v53  ;;  %s2933_s3 = scalar_lea.vmem [#allocation18], %s1766_s15  ;;  %s3161_s7 = sld [smem:[#allocation37_spill]]  ;;  %vm1173_vm7 = vcmask 126016   ;;  %vm1295_vm8 = vcmask 191616   ;;  %vm1419_vm9 = vcmask 257216  }
 0x100   : > { %v2047_v1 = vld [vmem:[%s3156_s0] sm:$0xff]   ;;  %v2048_v2 = vld [vmem:[%s3156_s0 + $0x8] sm:$0xff]   ;;  %v982_v55 = vsel %vm932_vm5, 16843009, %v2423_v54  ;;  %s2425_s26 = smov 16   ;;  %s2426_s18 = smov 24  }
 0x101   : > { %1841 = vmatpush3.bf16.msra.mxu0 %v2047_v1  ;;  %v1767_v8 = vld [vmem:[%s3157_s30] ss:$0 sm:$0xff]  ;;  %v983_v56 = vunpack.c.0.s8 %v982_v55  ;;  %s1554_s15 = sshll.u32 %s2933_s3, 4  ;;  %s3163_s27 = sld [smem:[#allocation42_spill]]  ;;  %s2983_s15 = int_to_ptr.vmem [resolvable:$true] %s1554_s15 }
 0x102   : > { %1842 = vmatprep.subr.bf16.mxu0 %v2418_v0  ;;  %v1776_v15 = vld [vmem:[%s3158_s12] ss:$0 sm:$0xff]  ;;  %1851 = vmatpush3.bf16.msra.mxu1 %v2052_v16  ;;  %p3164_p11 = scmp.ne.s32.totalorder %s3144_s25, 0  ;;  %s2427_s12 = smov [#allocation18]  }
 0x103   : > { %1864 = vmatprep.subr.bf16.mxu1 %v2418_v0  ;;  %vm2905_vm6 = vcmp.ne.s32.totalorder %v983_v56, 0 }
 0x105   : > { %1843 = vmatpush3.bf16.msra.mxu0 %v2048_v2  ;;  %1853 = vmatmul.mubr.msk.bf16.vlgmr.msra.gmra.mrb[0].mxu1 %vm692_vm1, %v668_v21 }
 0x106   : > { %1856 = vmatprep.subr.bf16.mxu0 %v2418_v0  ;;  %1866 = vmatprep.mubr.msk.bf16.mxu1 %vm2419_vm0, %v2418_v0 }
 0x108   : > { %1845 = vmatmul.mubr.msk.bf16.vlgmr.msra.gmra.mrb[0].mxu0 %vm692_vm1, %v667_v3 }
 0x109   : > { %1857 = vmatpush3.bf16.msra.mxu0 %v2049_v4  ;;  %1860 = vmatprep.mubr.msk.bf16.mxu0 %vm2419_vm0, %v2418_v0 }
 0x10a   : > { %1858 = vmatprep.subr.bf16.mxu0 %v2418_v0 }
 0x10d   : > { %1859 = vmatpush3.bf16.msra.mxu0 %v2050_v5 }
 0x10e   : > { %1870 = vmatprep.subr.bf16.mxu0 %v2418_v0 }
 0x110   : > { %1861 = vmatmul.mubr.msk.bf16.vlgmr.msra.gmra.mrb[4].mxu0 %vm692_vm1, %v861_v7 }
 0x111   : > { %1872 = vmatprep.mubr.msk.bf16.mxu0 %vm2419_vm0, %v2418_v0 }
 0x1d8   : > { %v796_v45 = vpop.f32.mrb[0].mxu1 }
 0x1d9   : > { %v797_v46 = vadd.f32 %v1771_v44, %v796_v45  ;;  %v1854_v47 = vpop.f32.mrb[1].mxu1 }
 0x1da   : > { %v799_v48 = vpop.f32.mrb[2].mxu1 }
 0x1db   : > { %v730_v9 = vpop.f32.mrb[0].mxu0  ;;  %v2898_v49 = vpack.c.bf16 %v797_v46, %v797_v46  ;;  %v1855_v50 = vpop.f32.mrb[3].mxu1 }
 0x1dc   : > { %v1846_v10 = vpop.f32.mrb[1].mxu0  ;;  %v731_v11 = vadd.f32 %v1767_v8, %v730_v9 }
 0x1dd   : > { %v733_v12 = vpop.f32.mrb[2].mxu0  ;;  %841 = vst.msk [vmem:[#allocation3] sm:$0xf] %vm840_vm4, %v2898_v49 }
 0x1de   : > { %802 = vxpose.xlu0.b32.start.end [1/1] (short) (narrow) %v731_v11, 32  ;;  %v1847_v14 = vpop.f32.mrb[3].mxu0 }
 0x1e3   : > { %v923_v17 = vpop.f32.mrb[4].mxu0 }
 0x1e4   : > { %v924_v18 = vadd.f32 %v1776_v15, %v923_v17  ;;  %v1862_v19 = vpop.f32.mrb[5].mxu0  ;;  %v1000_v51 = vld [vmem:[#allocation3] sm:$0xf] }
 0x1e5   : > { %v926_v20 = vpop.f32.mrb[6].mxu0  ;;  %v1005_v52 = vsel %vm938_vm3, %v1000_v51, 0 }
 0x1e6   : > { %v929_v22 = vmul.f32 0.35355338, %v924_v18  ;;  %v1863_v23 = vpop.f32.mrb[7].mxu0  ;;  %1871 = vmatpush3.bf16.msra.mxu0 %v1005_v52 }
 0x1e7   : > { %1882 = vmatprep.subr.bf16.mxu0 %v2418_v0 }
 0x1e8   : > { %v930_v24 = vpack.c.bf16 %v929_v22, %v929_v22 }
 0x1ea   : > { %1176 = vrot.lane.b32.xlu1 %v930_v24, %s2420_s13 }
 0x1ee   : > { %1298 = vrot.lane.b32.xlu1 %v930_v24, %s2421_s6 }
 0x213   : > { %1052 = vrot.lane.b32.xlu0 %v930_v24, %s2422_s14 }
 0x25c   : > { %v1177_v41 = vpop.permute.xlu1 %1176 }
 0x25e   : > { %v818_v25 = vpop.trf.xlu0 }
 0x260   : > { %v1299_v43 = vpop.permute.xlu1 %1298 }
 0x262   : > { %v819_v26 = vpop.trf.xlu0 }
 0x263   : > { %v834_v27 = vpack.c.bf16 %v819_v26, %v818_v25 }
 0x265   : > { %837 = vst.msk [vmem:[#allocation2] sm:$0xff] %vm836_vm2, %v834_v27 }
 0x266   : > { %v820_v28 = vpop.trf.xlu0 }
 0x26a   : > { %v821_v29 = vpop.trf.xlu0 }
 0x26b   : > { %v835_v30 = vpack.c.bf16 %v821_v29, %v820_v28 }
 0x26c   : > { %v933_v31 = vld [vmem:[#allocation2] sm:$0xf]  ;;  %v1050_v32 = vld [vmem:[#allocation2] sm:$0xf0] }
 0x26d   : > { %v940_v33 = vsel %vm938_vm3, %v933_v31, 0  ;;  %v1055_v34 = vrot.slane %v1050_v32, 4  ;;  %838 = vst.msk [vmem:[#allocation2 + $0x8] sm:$0xff] %vm836_vm2, %v835_v30 }
 0x26e   : > { %1865 = vmatpush3.bf16.msra.mxu1 %v940_v33 }
 0x26f   : > { %1876 = vmatprep.subr.bf16.mxu1 %v2418_v0  ;;  %v1060_v35 = vsel %vm938_vm3, %v1055_v34, 0 }
 0x271   : > { %1867 = vmatmul.mubr.msk.bf16.vlgmr.msra.gmra.mrb[4].mxu1 %vm836_vm2, %v930_v24 }
 0x272   : > { %1877 = vmatpush3.bf16.msra.mxu1 %v1060_v35  ;;  %1878 = vmatprep.mubr.msk.bf16.mxu1 %vm2419_vm0, %v2418_v0 }
 0x273   : > { %1888 = vmatprep.subr.bf16.mxu1 %v2418_v0 }
 0x274   : > { %v1175_v36 = vld [vmem:[#allocation2 + $0x8] sm:$0xf]  ;;  %v1297_v39 = vld [vmem:[#allocation2 + $0x8] sm:$0xf0] }
 0x275   : > { %v1182_v37 = vsel %vm938_vm3, %v1175_v36, 0  ;;  %v1301_v40 = vrot.slane %v1297_v39, 4 }
 0x277   : > { %v1306_v42 = vsel %vm938_vm3, %v1301_v40, 0 }
 0x285   : > { %v1053_v38 = vpop.permute.xlu0 %1052 }
 0x286   : > { %1879 = vmatmul.mubr.msk.bf16.vlgmr.msra.gmra.mrb[8].mxu1 %vm836_vm2, %v1053_v38 }
 0x287   : > { %1889 = vmatpush3.bf16.msra.mxu1 %v1182_v37  ;;  %1890 = vmatprep.mubr.msk.bf16.mxu1 %vm2419_vm0, %v2418_v0 }
 0x288   : > { %1900 = vmatprep.subr.bf16.mxu1 %v2418_v0 }
 0x28e   : > { %1891 = vmatmul.mubr.msk.bf16.vlgmr.msra.gmra.mrb[12].mxu1 %vm836_vm2, %v1177_v41 }
 0x28f   : > { %1901 = vmatpush3.bf16.msra.mxu1 %v1306_v42  ;;  %1902 = vmatprep.mubr.msk.bf16.mxu1 %vm2419_vm0, %v2418_v0 }
 0x290   : > { %1912 = vmatprep.subr.bf16.mxu1 %v2418_v0 }
 0x296   : > { %1903 = vmatmul.mubr.msk.bf16.vlgmr.msra.gmra.mrb[16].mxu1 %vm836_vm2, %v1299_v43 }
 0x297   : > { %1916 = vmatprep.mubr.msk.bf16.mxu1 %vm2419_vm0, %v2418_v0 }
 0x344   : > { %v976_v58 = vpop.f32.mrb[4].mxu1 }
 0x345   : > { %v985_v59 = vsel %vm2905_vm6, -1e+09, %v976_v58  ;;  %v1868_v60 = vpop.f32.mrb[5].mxu1 }
 0x346   : > { %v979_v61 = vpop.f32.mrb[6].mxu1  ;;  %v986_v62 = vsel %vm836_vm2, %v985_v59, -inf }
 0x347   : > { %987 = vmax.xlane.f32.xlu1 %v986_v62  ;;  %v1869_v63 = vpop.f32.mrb[7].mxu1 }
 0x359   : > { %v1096_v1 = vpop.f32.mrb[8].mxu1 }
 0x35a   : > { %v1102_v2 = vsel %vm2905_vm6, -1e+09, %v1096_v1  ;;  %v1880_v3 = vpop.f32.mrb[9].mxu1 }
 0x35b   : > { %v1103_v4 = vsel %vm836_vm2, %v1102_v2, -inf  ;;  %v1099_v5 = vpop.f32.mrb[10].mxu1 }
 0x35c   : > { %1104 = vmax.xlane.f32.xlu1 %v1103_v4  ;;  %v1881_v7 = vpop.f32.mrb[11].mxu1 }
 0x361   : > { %v1218_v8 = vpop.f32.mrb[12].mxu1 }
 0x362   : > { %v1224_v9 = vsel %vm2905_vm6, -1e+09, %v1218_v8  ;;  %v1892_v10 = vpop.f32.mrb[13].mxu1 }
 0x363   : > { %v1225_v11 = vsel %vm836_vm2, %v1224_v9, -inf  ;;  %v1221_v12 = vpop.f32.mrb[14].mxu1 }
 0x364   : > { %1226 = vmax.xlane.f32.xlu1 %v1225_v11  ;;  %v1893_v13 = vpop.f32.mrb[15].mxu1 }
 0x365   : > { %v2053_v13 = vld [vmem:[%s3161_s7] sm:$0xff]  }
 0x366   : > { %1913 = vmatpush3.bf16.msra.mxu1 %v2053_v13 }
 0x367   : > { %1914 = vmatprep.subr.bf16.mxu1 %v2418_v0 }
 0x369   : > { %v1342_v14 = vpop.f32.mrb[16].mxu1 }
 0x36a   : > { %v1348_v15 = vsel %vm2905_vm6, -1e+09, %v1342_v14  ;;  %v1904_v16 = vpop.f32.mrb[17].mxu1 }
 0x36b   : > { %v1349_v17 = vsel %vm836_vm2, %v1348_v15, -inf  ;;  %v1345_v18 = vpop.f32.mrb[18].mxu1 }
 0x36c   : > { %1350 = vmax.xlane.f32.xlu1 %v1349_v17  ;;  %v1905_v19 = vpop.f32.mrb[19].mxu1 }
 0x3d4   : > { %v988_v20 = vpop.xlane.xlu1 %987 }
 0x3d5   : > { %v989_v21 = vsub.f32 %v985_v59, %v988_v20 }
 0x3d7   : > { %v990_v22 = vmul.f32 1.442695, %v989_v21 }
 0x3d9   : > { %2055 = vpow2.f32 %v990_v22 }
 0x3e3   : > { %v2056_v23 = vpop.eup %2055 }
 0x3e4   : > { %v992_v24 = vsel %vm836_vm2, %v2056_v23, 0.0 }
 0x3e5   : > { %993 = vadd.xlane.f32.xlu1 %v992_v24 }
 0x3e9   : > { %v1105_v25 = vpop.xlane.xlu1 %1104 }
 0x3ea   : > { %v1106_v26 = vsub.f32 %v1102_v2, %v1105_v25 }
 0x3ec   : > { %v1107_v27 = vmul.f32 1.442695, %v1106_v26 }
 0x3ee   : > { %2057 = vpow2.f32 %v1107_v27 }
 0x3f1   : > { %v1227_v30 = vpop.xlane.xlu1 %1226 }
 0x3f2   : > { %v1228_v31 = vsub.f32 %v1224_v9, %v1227_v30 }
 0x3f4   : > { %v1229_v33 = vmul.f32 1.442695, %v1228_v31 }
 0x3f6   : > { %845 = vrot.lane.b32.xlu1 %v2898_v49, %s2422_s14  ;;  %2059 = vpow2.f32 %v1229_v33  ;;  %s1811_s14 = sshll.u32 %s2399_s21, 9 }
 0x3f7   : > { %s2981_s30 = scalar_lea.hbm %s3163_s27, %s1811_s14 }
 0x3f8   : > { %v2058_v28 = vpop.eup %2057 }
 0x3f9   : > { %v1109_v29 = vsel %vm836_vm2, %v2058_v28, 0.0  ;;  %v1351_v32 = vpop.xlane.xlu1 %1350 }
 0x3fa   : > { %1110 = vadd.xlane.f32.xlu0 %v1109_v29  ;;  %v1352_v34 = vsub.f32 %v1348_v15, %v1351_v32  ;;  %v2054_v15 = vld [vmem:[%s3161_s7 + $0x8] sm:$0xff]  }
 0x3fb   : > { %1915 = vmatpush3.bf16.msra.mxu1 %v2054_v15 }
 0x3fc   : > { %v1353_v35 = vmul.f32 1.442695, %v1352_v34 }
 0x3fe   : > { %2061 = vpow2.f32 %v1353_v35 }
 0x400   : > { %v2060_v36 = vpop.eup %2059 }
 0x401   : > { %v1231_v37 = vsel %vm836_vm2, %v2060_v36, 0.0 }
 0x408   : > { %v2062_v38 = vpop.eup %2061 }
 0x409   : > { %v1355_v39 = vsel %vm836_vm2, %v2062_v38, 0.0 }
 0x410   : > { %855 = vrot.lane.b32.xlu0 %v2898_v49, %s2421_s6  ;;  %s3162_s6 = sld [smem:[#allocation38_spill]] }
 0x41a   : > { %1232 = vadd.xlane.f32.xlu1 %v1231_v37 }
 0x41e   : > { %1356 = vadd.xlane.f32.xlu1 %v1355_v39 }
 0x42f   : > { %850 = vrot.lane.b32.xlu1 %v2898_v49, %s2420_s13  ;;  %s2281_s13 = sshll.u32 %s2427_s12, 4  ;;  %s2282_s13 = int_to_ptr.vmem [resolvable:$false] %s2281_s13 }
 0x430   : > { %p2284_p0 = scmp.lt.s32.totalorder %s2983_s15, %s2282_s13 }
 0x472   : > { %v994_v40 = vpop.xlane.xlu1 %993 }
 0x473   : > { %2063 = vrcp.f32 %v994_v40 }
 0x476   : > { %v846_v41 = vpop.permute.xlu1 %845 }
 0x477   : > { %849 = vst.msk [vmem:[#allocation3 + $0x4] sm:$0xf] %vm840_vm4, %v846_v41 }
 0x47d   : > { %v2064_v42 = vpop.eup %2063 }
 0x47e   : > { %v997_v43 = vmul.f32 %v2064_v42, %v2056_v23  ;;  %v1119_v44 = vld [vmem:[#allocation3 + $0x4] sm:$0xf] }
 0x47f   : > { %v1124_v46 = vsel %vm938_vm3, %v1119_v44, 0 }
 0x480   : > { %998 = vst.msk [vmem:[%s2933_s3] sm:$0xff] %vm836_vm2, %v997_v43  ;;  %v999_v45 = vpack.c.bf16 %v997_v43, %v997_v43 }
 0x482   : > { %1873 = vmatmul.mubr.msk.bf16.vlgmr.msra.gmra.mrb[8].mxu0 %vm836_vm2, %v999_v45 }
 0x483   : > { %1883 = vmatpush3.bf16.msra.mxu0 %v1124_v46  ;;  %1884 = vmatprep.mubr.msk.bf16.mxu0 %vm2419_vm0, %v2418_v0 }
 0x484   : > { %1894 = vmatprep.subr.bf16.mxu0 %v2418_v0 }
 0x487   : > { %v1111_v47 = vpop.xlane.xlu0 %1110 }
 0x488   : > { %2065 = vrcp.f32 %v1111_v47 }
 0x48b   : > { %v856_v48 = vpop.permute.xlu0 %855 }
 0x48c   : > { %859 = vst.msk [vmem:[#allocation3 + $0xc] sm:$0xf] %vm840_vm4, %v856_v48 }
 0x492   : > { %v2066_v49 = vpop.eup %2065 }
 0x493   : > { %v1114_v50 = vmul.f32 %v2066_v49, %v2058_v28  ;;  %v1365_v61 = vld [vmem:[#allocation3 + $0xc] sm:$0xf]  ;;  %v1794_v28 = vld [vmem:[%s3162_s6] ss:$0 sm:$0xff] }
 0x494   : > { %v1370_v63 = vsel %vm938_vm3, %v1365_v61, 0 }
 0x495   : > { %1783 = vst.msk [vmem:[%s2933_s3 + $0x8] sm:$0xff] %vm836_vm2, %v1114_v50  ;;  %v1117_v51 = vpack.c.bf16 %v1114_v50, %v1114_v50 }
 0x497   : > { %1885 = vmatmul.mubr.msk.bf16.vlgmr.msra.gmra.mrb[12].mxu0 %vm836_vm2, %v1117_v51 }
 0x498   : > { %1896 = vmatprep.mubr.msk.bf16.mxu0 %vm2419_vm0, %v2418_v0 }
 0x4a7   : > { %v1233_v52 = vpop.xlane.xlu1 %1232 }
 0x4a8   : > { %2067 = vrcp.f32 %v1233_v52 }
 0x4ab   : > { %v1357_v53 = vpop.xlane.xlu1 %1356 }
 0x4ac   : > { %2069 = vrcp.f32 %v1357_v53 }
 0x4af   : > { %v851_v54 = vpop.permute.xlu1 %850 }
 0x4b0   : > { %854 = vst.msk [vmem:[#allocation3 + $0x8] sm:$0xf] %vm840_vm4, %v851_v54 }
 0x4b2   : > { %v2068_v55 = vpop.eup %2067 }
 0x4b3   : > { %v1236_v56 = vmul.f32 %v2068_v55, %v2060_v36 }
 0x4b5   : > { %1787 = vst.msk [vmem:[%s2933_s3 + $0x10] sm:$0xff] %vm836_vm2, %v1236_v56  ;;  %v1239_v62 = vpack.c.bf16 %v1236_v56, %v1236_v56 }
 0x4b6   : > { %v2070_v57 = vpop.eup %2069 }
 0x4b7   : > { %v1360_v58 = vmul.f32 %v2070_v57, %v2062_v38  ;;  %v1241_v59 = vld [vmem:[#allocation3 + $0x8] sm:$0xf] }
 0x4b8   : > { %v1246_v60 = vsel %vm938_vm3, %v1241_v59, 0 }
 0x4b9   : > { %1791 = vst.msk [vmem:[%s2933_s3 + $0x18] sm:$0xff] %vm836_vm2, %v1360_v58  ;;  %1895 = vmatpush3.bf16.msra.mxu0 %v1246_v60  ;;  %v1363_v1 = vpack.c.bf16 %v1360_v58, %v1360_v58  ;;  %s2283_s3 = scalar_lea.vmem %s2282_s13, 1024 }
 0x4ba   : > { %1906 = vmatprep.subr.bf16.mxu0 %v2418_v0 }
 0x4bc   : > { %1897 = vmatmul.mubr.msk.bf16.vlgmr.msra.gmra.mrb[16].mxu0 %vm836_vm2, %v1239_v62 }
 0x4bd   : > { %1907 = vmatpush3.bf16.msra.mxu0 %v1370_v63  ;;  %1908 = vmatprep.mubr.msk.bf16.mxu0 %vm2419_vm0, %v2418_v0 }
 0x4c4   : > { %1909 = vmatmul.mubr.msk.bf16.vlgmr.msra.gmra.mrb[20].mxu0 %vm836_vm2, %v1363_v1 }
 0x555   : > { %v1041_v2 = vpop.f32.mrb[8].mxu0 }
 0x556   : > { %v1047_v3 = vpack.c.bf16 %v1041_v2, %v1041_v2  ;;  %v1874_v4 = vpop.f32.mrb[9].mxu0 }
 0x557   : > { %v1044_v5 = vpop.f32.mrb[10].mxu0 }
 0x558   : > { %1049 = vst.msk [vmem:[#allocation4] sm:$0xf] %vm840_vm4, %v1047_v3  ;;  %v1875_v7 = vpop.f32.mrb[11].mxu0 }
 0x56a   : > { %v1160_v8 = vpop.f32.mrb[12].mxu0 }
 0x56b   : > { %v1808_v9 = vpack.c.bf16 %v1160_v8, %v1160_v8  ;;  %v1886_v10 = vpop.f32.mrb[13].mxu0 }
 0x56c   : > { %v1163_v11 = vpop.f32.mrb[14].mxu0 }
 0x56d   : > { %1170 = vrot.lane.b32.xlu1 %v1808_v9, %s2424_s1  ;;  %v1887_v12 = vpop.f32.mrb[15].mxu0 }
 0x58f   : > { %v1282_v14 = vpop.f32.mrb[16].mxu0 }
 0x590   : > { %v1809_v16 = vpack.c.bf16 %v1282_v14, %v1282_v14  ;;  %v1898_v17 = vpop.f32.mrb[17].mxu0 }
 0x591   : > { %v1285_v18 = vpop.f32.mrb[18].mxu0 }
 0x592   : > { %1292 = vrot.lane.b32.xlu1 %v1809_v16, %s2425_s26  ;;  %v1899_v19 = vpop.f32.mrb[19].mxu0  ;;  %s1526_s26 = scalar_lea.sflag [#allocation19], %s2803_s17 }
 0x597   : > { %v1406_v20 = vpop.f32.mrb[20].mxu0 }
 0x598   : > { %v1810_v21 = vpack.c.bf16 %v1406_v20, %v1406_v20  ;;  %v1910_v22 = vpop.f32.mrb[21].mxu0 }
 0x599   : > { %v1409_v23 = vpop.f32.mrb[22].mxu0 }
 0x59a   : > { %1416 = vrot.lane.b32.xlu1 %v1810_v21, %s2426_s18  ;;  %v1911_v24 = vpop.f32.mrb[23].mxu0  ;;  %s2277_s18 = scalar_lea.vmem %s2983_s15, 512 }
 0x59b   : > { %p2278_p5 = scmp.ne.s32.totalorder %s2983_s15, %s2277_s18  ;;  %p2285_p2 = scmp.lt.s32.totalorder %s2283_s3, %s2277_s18 }
 0x59d   : > { %p2279_p13 = pnand %p2278_p5, %p3164_p11  ;;  %p2286_p7 = por %p2285_p2, %p2284_p0 }
 0x59f   : > { %p2280_p3 = pneg %p2279_p13 }
 0x5a1   : > { %p2287_p9 = pnand %p2286_p7, %p2280_p3 }
 0x5df   : > { %v1171_v25 = vpop.permute.xlu1 %1170 }
 0x5e0   : > { %1174 = vst.msk [vmem:[#allocation4] sm:$0xf] %vm1173_vm7, %v1171_v25 }
 0x604   : > { %v1293_v26 = vpop.permute.xlu1 %1292 }
 0x605   : > { %1296 = vst.msk [vmem:[#allocation4] sm:$0xf] %vm1295_vm8, %v1293_v26 }
 0x60c   : > { %v1417_v0 = vpop.permute.xlu1 %1416 }
 0x60d   : > { %1420 = vst.msk [vmem:[#allocation4] sm:$0xf] %vm1419_vm9, %v1417_v0 }
 0x614   : > { %v1421_v27 = vld [vmem:[#allocation4] sm:$0xf] }
 0x615   : > { %1917 = vmatmul.mubr.msk.bf16.vlgmr.msra.gmra.mrb[20].mxu1 %vm692_vm1, %v1421_v27 }
 0x6e8   : > { %v1482_v29 = vpop.f32.mrb[20].mxu1 }
 0x6e9   : > { %v1483_v30 = vadd.f32 %v1794_v28, %v1482_v29  ;;  %v1918_v31 = vpop.f32.mrb[21].mxu1 }
 0x6ea   : > { %v1485_v32 = vpop.f32.mrb[22].mxu1 }
 0x6eb   : > { %v1919_v33 = vpop.f32.mrb[23].mxu1  ;;  %v1488_v34 = vadd.f32 %v1483_v30, %v2853_v6 }
 0x6ed   : > { %v1489_v35 = vsel %vm692_vm1, %v1488_v34, 0.0 }
 0x6ee   : > { %1490 = vadd.xlane.f32.xlu1 %v1489_v35 }
 0x77b   : > { %v1491_v36 = vpop.xlane.xlu1 %1490 }
 0x77c   : > { %v1493_v37 = vmul.f32 0.03125, %v1491_v36 }
 0x77e   : > { %v1494_v38 = vsub.f32 %v1488_v34, %v1493_v37 }
 0x780   : > { %v1495_v39 = vmul.f32 %v1494_v38, %v1494_v38 }
 0x782   : > { %v1496_v40 = vsel %vm692_vm1, %v1495_v39, 0.0 }
 0x783   : > { %1497 = vadd.xlane.f32.xlu0 %v1496_v40 }
 0x784   : > { %2290 = shalt.err (!%p2287_p9)
}
 0x785   : > { %s2291_s6 = scalar_lea.hbm %s2981_s30, 512  ;;  %s2295_s16 = scalar_lea.hbm %s3163_s27, 1024 }
 0x786   : > { %p2292_p6 = scmp.ne.s32.totalorder %s2981_s30, %s2291_s6  ;;  %p2296_p12 = scmp.lt.u32.totalorder %s2981_s30, %s3163_s27 }
 0x787   : > { %p2297_p1 = scmp.lt.u32.totalorder %s2295_s16, %s2291_s6  ;;  %p2299_p5 = scmp.lt.u32.totalorder %s2291_s6, %s2981_s30 }
 0x788   : > { %p2293_p10 = pnand %p2292_p6, %p3164_p11 }
 0x789   : > { %p2298_p8 = por %p2297_p1, %p2296_p12 }
 0x78a   : > { %p2294_p4 = pneg %p2293_p10 }
 0x78b   : > { %p2300_p13 = por %p2299_p5, %p2298_p8 }
 0x78d   : > { %p2301_p3 = pnand %p2300_p13, %p2294_p4 }
 0x78f   : > { %2304 = shalt.err (!%p2301_p3)
}
 0x790   : > { %s2428_s18 = smov 128   ;;  %s3165_s14 = sld [smem:[#allocation39_spill]] }
 0x791   : > { %1941 = dma.vmem_to_hbm [thread:$0]  (%p3164_p11), %s2983_s15, 512, %s2981_s30, %s1526_s26, %s2428_s18, %s2428_s18, %s2424_s1  }
 0x792   : > { %s3166_s12 = sld [smem:[#allocation40_spill]]  ;;  %s1802_s13 = sshll.u32 %s2399_s21, 7 }
 0x793   : > { %s652_s0 = scalar_lea.vmem [#allocation17], %s1760_s29  ;;  %s3167_s26 = sld [smem:[#allocation41_spill]] }
 0x794   : > { %s1540_s1 = sshll.u32 %s652_s0, 4  ;;  %s1521_s3 = scalar_lea.sflag [#allocation7], %s2803_s17  ;;  %s3024_s1 = int_to_ptr.vmem [resolvable:$true] %s1540_s1 }
 0x795   : > { %s2305_s6 = scalar_lea.vmem %s3024_s1, 128  ;;  %s2429_s21 = smov [#allocation17]  }
 0x796   : > { %v1798_v44 = vld [vmem:[%s3165_s14] ss:$0 sm:$0xff]  ;;  %p2306_p0 = scmp.ne.s32.totalorder %s3024_s1, %s2305_s6  ;;  %s2309_s29 = sshll.u32 %s2429_s21, 4  ;;  %s2310_s29 = int_to_ptr.vmem [resolvable:$false] %s2309_s29 }
 0x797   : > { %s2311_s14 = scalar_lea.vmem %s2310_s29, 256  ;;  %p2312_p9 = scmp.lt.s32.totalorder %s3024_s1, %s2310_s29 }
 0x798   : > { %v1799_v46 = vld [vmem:[%s3166_s12] ss:$0 sm:$0xff]  ;;  %p2307_p2 = pnand %p2306_p0, %p3164_p11  ;;  %p2313_p6 = scmp.lt.s32.totalorder %s2311_s14, %s2305_s6 }
 0x799   : > { %s3022_s18 = scalar_lea.hbm %s3167_s26, %s1802_s13 }
 0x79a   : > { %p2308_p7 = pneg %p2307_p2  ;;  %p2314_p10 = por %p2313_p6, %p2312_p9 }
 0x79c   : > { %p2315_p4 = pnand %p2314_p10, %p2308_p7 }
 0x810   : > { %v1498_v6 = vpop.xlane.xlu0 %1497 }
 0x811   : > { %v1499_v41 = vmul.f32 0.03125, %v1498_v6 }
 0x813   : > { %v1500_v42 = vadd.f32 1e-05, %v1499_v41 }
 0x815   : > { %2071 = vrsqrt.f32 %v1500_v42 }
 0x81f   : > { %v2072_v43 = vpop.eup %2071 }
 0x820   : > { %v1502_v45 = vmul.f32 %v2072_v43, %v1494_v38 }
 0x822   : > { %v1510_v47 = vmul.f32 %v1798_v44, %v1502_v45 }
 0x824   : > { %v1518_v48 = vadd.f32 %v1799_v46, %v1510_v47 }
 0x826   : > { %1519 = vst.msk [vmem:[%s652_s0] sm:$0xff] %vm692_vm1, %v1518_v48 }
 0x827   : > { %2318 = shalt.err (!%p2315_p4)
}
 0x828   : > { %s2319_s17 = scalar_lea.hbm %s3022_s18, 128  ;;  %s2323_s16 = scalar_lea.hbm %s3167_s26, 256 }
 0x829   : > { %p2320_p12 = scmp.ne.s32.totalorder %s3022_s18, %s2319_s17  ;;  %p2324_p5 = scmp.lt.u32.totalorder %s3022_s18, %s3167_s26 }
 0x82a   : > { %p2325_p13 = scmp.lt.u32.totalorder %s2323_s16, %s2319_s17  ;;  %p2327_p0 = scmp.lt.u32.totalorder %s2319_s17, %s3022_s18 }
 0x82b   : > { %p2321_p1 = pnand %p2320_p12, %p3164_p11 }
 0x82c   : > { %p2326_p3 = por %p2325_p13, %p2324_p5 }
 0x82d   : > { %p2322_p8 = pneg %p2321_p1 }
 0x82e   : > { %p2328_p2 = por %p2327_p0, %p2326_p3 }
 0x830   : > { %p2329_p7 = pnand %p2328_p2, %p2322_p8 }
 0x832   : > { %2332 = shalt.err (!%p2329_p7)
}
 0x833   : > { %1940 = dma.vmem_to_hbm [thread:$0]  (%p3164_p11), %s3024_s1, 128, %s3022_s18, %s1521_s3  }
 0x834 PF: > { %s3168_s15 = sld [smem:[#allocation27_spill]]  ;;  %s3169_s30 = sld [smem:[#allocation29_spill]] }
 0x835   : > { %p3171_p6 = scmp.ge.s32.totalorder %s2407_s23, 2 }
 0x83a   : > { %s1569_s6 = sand.u32 1, %s3168_s15   ;;  %p3170_p9 = scmp.ne.s32.totalorder %s3169_s30, 0 }
 0x83b   : > { %s1570_s21 = scalar_lea.sflag [#allocation7], %s1569_s6 }
 0x83c   : > { %p1968_p10 = pnand %p3171_p6, %p3170_p9 }
 0x83e   : > { %2378 = dma.done.wait (!%p1968_p10), %s1570_s21, 128  }
 0x83f   : > { %2380 = vsyncadd (!%p1968_p10), %s1570_s21, 4294967168  ;;  %s1579_s29 = scalar_lea.sflag [#allocation19], %s1569_s6 }
 0x840   : > { %2382 = dma.done.wait (!%p1968_p10), %s1579_s29, 512  }
 0x841   : > { %2384 = vsyncadd (!%p1968_p10), %s1579_s29, 4294966784  ;;  %s40_s23 = sadd.s32 1, %s2407_s23   ;;  %s3172_s18 = smov %s2391_s19 }
 0x842   : > { %p37_p4 = scmp.ge.s32.totalorder %s40_s23, 4   ;;  %s3173_s19 = smov %s2395_s20 }
 0x843   : > { %s3174_s20 = smov %s2730_s10  ;;  %s3175_s21 = smov %s2403_s22 }
 0x844   : > { %s3176_s22 = smov %s3178_s11  ;;  %39 = sbr.rel (!%p37_p4) target bundleno = 25 (0x19), region = 186 }
 0x84b   :  { %1584 = vsyncpa [#allocation6], 1 }
 0x84c   :  { %1586 = vsyncpa [#allocation6 + $0x1], 1 }
 0x84d   :  { %1587 = vsyncpa [#allocation9], 1 }
 0x84e   :  { %1588 = vsyncpa [#allocation12], 1 }
 0x84f   :  { %1590 = vsyncpa [#allocation12 + $0x1], 1 }
 0x850   :  { %1591 = vsyncpa [#allocation15], 1 }
 0x851   :  { %1592 = vsyncpa [#allocation7], 1 }
 0x852   :  { %1594 = vsyncpa [#allocation7 + $0x1], 1 }
 0x853   :  { %1595 = vsyncpa [#allocation19], 1 }
 0x854   :  { %1597 = vsyncpa [#allocation19 + $0x1], 1 }

</bundles_post_ra>
